<compile_context>
chip_gen: v6e
topology: v6e:2x2x1
jax: 0.10.0
libtpu: 0.0.40
codegen_flags: <defaults>
</compile_context>

<pallas_src>
import functools

import jax
import jax.numpy as jnp
import numpy as np
from jax import lax
from jax.experimental import pallas as pl
from jax.experimental.pallas import tpu as pltpu


def _round_up(x, m):
    return ((x + m - 1) // m) * m


def _conv_bn_relu_kernel(x_ref, w_ref, shift_ref, o_ref, xpad_ref, *, has_relu):
    # x_ref:     (1, H, W, Cin)   activation tile (compute dtype: f32 or bf16)
    # w_ref:     (9*Cin, TCO)     im2col weights with BN scale folded in
    # shift_ref: (1, TCO)         f32 fused conv-bias + BN shift (0 in pad lanes)
    # o_ref:     (1, H, W, TCO)   f32 output; TCO is a multiple of 128 (lane dense)
    # xpad_ref:  (H+2, W+2, Cin)  VMEM scratch: spatially zero-padded tile
    H = o_ref.shape[1]
    W = o_ref.shape[2]

    # In-kernel halo: zero the scratch, then drop the tile into the interior.
    # This replaces the wrapper-side jnp.pad (a full HBM pass over the input).
    xpad_ref[...] = jnp.zeros_like(xpad_ref)
    xpad_ref[pl.ds(1, H), pl.ds(1, W), :] = x_ref[0]
    xp = xpad_ref[...]                                    # (H+2, W+2, Cin)

    # im2col: gather the 9 shifted taps once and fuse them along the channel
    # (lane) axis -> a single MXU matmul with K = 9*Cin instead of nine K=Cin
    # matmuls. The misaligned tap slices are handled on the XLU, which is
    # otherwise idle here.
    cols = [xp[kh:kh + H, kw:kw + W, :] for kh in range(3) for kw in range(3)]
    patch = jnp.concatenate(cols, axis=-1)                # (H, W, 9*Cin)

    acc = lax.dot_general(
        patch, w_ref[...],
        dimension_numbers=(((2,), (0,)), ((), ())),
        preferred_element_type=jnp.float32)               # (H, W, TCO) f32

    out = acc + shift_ref[0]                              # fused bias + BN (f32)
    if has_relu:
        out = jnp.maximum(out, 0.0)
    o_ref[...] = out[None].astype(o_ref.dtype)


def conv_block_nhwc(x_nhwc, w_oihw, bias, gamma, beta, running_mean, running_var,
                    *, eps=1e-5, has_relu=True, compute_dtype=jnp.float32):
    """ConvBlock forward, NHWC in / NHWC out. x_nhwc: (N, H, W, Cin) f32."""
    N, H, W, Cin = x_nhwc.shape
    Cout = w_oihw.shape[0]
    K = 9 * Cin
    cout_pad = _round_up(Cout, 128)        # lane-dense output stores
    tco = min(cout_pad, 128)               # per-grid-step Cout tile
    n_co = cout_pad // tco

    # ---- parameter folding (tiny, one-time, plain JAX) ----
    scale = gamma / jnp.sqrt(running_var + eps)                        # (Cout,)
    shift = (bias - running_mean) * scale + beta                       # (Cout,)
    # (Cout,Cin,3,3) -> rows ordered (kh*3+kw)*Cin + ci; fold BN scale into cols.
    w2d = jnp.transpose(w_oihw, (2, 3, 1, 0)).reshape(K, Cout) * scale[None, :]
    w2d = jnp.pad(w2d, ((0, 0), (0, cout_pad - Cout))).astype(compute_dtype)
    shift_p = jnp.pad(shift, (0, cout_pad - Cout)).reshape(1, cout_pad)
    shift_p = shift_p.astype(jnp.float32)
    x_c = x_nhwc.astype(compute_dtype)

    kernel = functools.partial(_conv_bn_relu_kernel, has_relu=has_relu)

    itemsize = jnp.dtype(compute_dtype).itemsize
    # Rough per-step VMEM need: double-buffered blocks + pad scratch + im2col
    # patch; clamp the scoped limit to stay safe on every chip generation
    # (v5e default 16 MiB scoped, v7x only 64 MiB physical).
    per_step = (2 * (H * W * Cin * itemsize + K * tco * itemsize + tco * 4
                     + H * W * tco * 4)
                + (H + 2) * (W + 2) * Cin * itemsize
                + H * W * K * itemsize)
    vmem_limit = int(min(48 * 2**20, max(32 * 2**20, 4 * per_step)))

    cost = pl.CostEstimate(
        flops=2 * N * H * W * K * cout_pad,
        transcendentals=0,
        bytes_accessed=(x_c.size * itemsize + w2d.size * itemsize
                        + shift_p.size * 4 + N * H * W * cout_pad * 4))

    out = pl.pallas_call(
        kernel,
        out_shape=jax.ShapeDtypeStruct((N, H, W, cout_pad), jnp.float32),
        grid_spec=pltpu.PrefetchScalarGridSpec(
            num_scalar_prefetch=0,
            grid=(N, n_co),
            in_specs=[
                pl.BlockSpec((1, H, W, Cin), lambda n, j: (n, 0, 0, 0)),
                pl.BlockSpec((K, tco), lambda n, j: (0, j)),
                pl.BlockSpec((1, tco), lambda n, j: (0, j)),
            ],
            out_specs=pl.BlockSpec((1, H, W, tco), lambda n, j: (n, 0, 0, j)),
            scratch_shapes=[pltpu.VMEM((H + 2, W + 2, Cin), compute_dtype)],
        ),
        compiler_params=pltpu.CompilerParams(
            dimension_semantics=("parallel", "parallel"),
            vmem_limit_bytes=vmem_limit),
        cost_estimate=cost,
    )(x_c, w2d, shift_p)

    return out[..., :Cout]                                # drop lane padding


def conv_block(x_nchw, w_oihw, bias, gamma, beta, running_mean, running_var,
               *, eps=1e-5, has_relu=True, compute_dtype=jnp.float32):
    """PyTorch-style NCHW interface. The transposes below are pure layout glue;
    in an NHWC model call conv_block_nhwc directly and they disappear."""
    x_nhwc = jnp.transpose(x_nchw, (0, 2, 3, 1))
    out_nhwc = conv_block_nhwc(x_nhwc, w_oihw, bias, gamma, beta, running_mean,
                               running_var, eps=eps, has_relu=has_relu,
                               compute_dtype=compute_dtype)
    return jnp.transpose(out_nhwc, (0, 3, 1, 2))


def _reference(x_nchw, w_oihw, bias, gamma, beta, running_mean, running_var,
               *, eps=1e-5, has_relu=True):
    y = lax.conv_general_dilated(
        x_nchw, w_oihw, window_strides=(1, 1), padding=((1, 1), (1, 1)),
        dimension_numbers=("NCHW", "OIHW", "NCHW"))
    y = y + bias[None, :, None, None]
    y = (y - running_mean[None, :, None, None]) / jnp.sqrt(
        running_var[None, :, None, None] + eps)
    y = y * gamma[None, :, None, None] + beta[None, :, None, None]
    if has_relu:
        y = jnp.maximum(y, 0.0)
    return y


if __name__ == "__main__":
    key = jax.random.PRNGKey(0)
    k_x, k_w, k_b, k_g, k_be, k_m, k_v = jax.random.split(key, 7)

    N, Cin, H, W = 2, 4, 16, 16
    Cout = 8

    x = jax.random.normal(k_x, (N, Cin, H, W), dtype=jnp.float32)
    w = jax.random.normal(k_w, (Cout, Cin, 3, 3), dtype=jnp.float32) * 0.1
    b = jax.random.normal(k_b, (Cout,), dtype=jnp.float32) * 0.1
    gamma = 1.0 + 0.1 * jax.random.normal(k_g, (Cout,), dtype=jnp.float32)
    beta = 0.1 * jax.random.normal(k_be, (Cout,), dtype=jnp.float32)
    running_mean = 0.1 * jax.random.normal(k_m, (Cout,), dtype=jnp.float32)
    running_var = 1.0 + 0.1 * jax.random.uniform(k_v, (Cout,), dtype=jnp.float32)

    ref = _reference(x, w, b, gamma, beta, running_mean, running_var,
                     eps=1e-5, has_relu=True)

    # f32 path
    out = conv_block(x, w, b, gamma, beta, running_mean, running_var,
                     eps=1e-5, has_relu=True, compute_dtype=jnp.float32)
    out = jax.block_until_ready(out)
    np.testing.assert_allclose(np.asarray(out), np.asarray(ref),
                               rtol=2e-4, atol=2e-4)

    # bf16 activations/weights, f32 accumulation + epilogue (v6e/v7x fast path)
    out_bf16 = conv_block(x, w, b, gamma, beta, running_mean, running_var,
                          eps=1e-5, has_relu=True, compute_dtype=jnp.bfloat16)
    out_bf16 = jax.block_until_ready(out_bf16)
    np.testing.assert_allclose(np.asarray(out_bf16), np.asarray(ref),
                               rtol=5e-2, atol=5e-2)

    print("KERNEL_OK")
</pallas_src>

<mosaic_0001>
module attributes {stable_mosaic.version = 11 : i64} {
  func.func @_conv_bn_relu_kernel(%arg0: i32, %arg1: i32, %arg2: memref<1x16x16x4xf32, #tpu.memory_space<vmem>>, %arg3: memref<36x128xf32, #tpu.memory_space<vmem>>, %arg4: memref<1x128xf32, #tpu.memory_space<vmem>>, %arg5: memref<1x16x16x128xf32, #tpu.memory_space<vmem>>, %arg6: memref<18x18x4xf32, #tpu.memory_space<vmem>>) attributes {dimension_semantics = [#tpu.dimension_semantics<parallel>, #tpu.dimension_semantics<parallel>], iteration_bounds = array<i64: 2, 1>, scalar_prefetch = 0 : i64, scratch_operands = 1 : i64, tpu.core_type = #tpu.core_type<tc>, window_params = [{transform_indices = @transform_0, window_bounds = array<i64: 1, 16, 16, 4>}, {transform_indices = @transform_1, window_bounds = array<i64: 36, 128>}, {transform_indices = @transform_2, window_bounds = array<i64: 1, 128>}, {transform_indices = @transform_3, window_bounds = array<i64: 1, 16, 16, 128>}]} {
    %cst = arith.constant 0.000000e+00 : f32
    %0 = vector.broadcast %cst : f32 to vector<18x18x4xf32>
    %c0 = arith.constant 0 : index
    %c0_0 = arith.constant 0 : index
    %c0_1 = arith.constant 0 : index
    %1 = vector.load %arg6[%c0, %c0_0, %c0_1] : memref<18x18x4xf32, #tpu.memory_space<vmem>>, vector<18x18x4xf32>
    tpu.vector_store %arg6[%c0, %c0_0, %c0_1], %0 {strides = array<i32>} : memref<18x18x4xf32, #tpu.memory_space<vmem>>, vector<18x18x4xf32>,
    %c0_2 = arith.constant 0 : index
    %c0_3 = arith.constant 0 : index
    %c0_4 = arith.constant 0 : index
    %c0_5 = arith.constant 0 : index
    %2 = vector.load %arg2[%c0_2, %c0_3, %c0_4, %c0_5] : memref<1x16x16x4xf32, #tpu.memory_space<vmem>>, vector<1x16x16x4xf32>
    %3 = vector.shape_cast %2 : vector<1x16x16x4xf32> to vector<16x16x4xf32>
    %c1 = arith.constant 1 : index
    %c1_6 = arith.constant 1 : index
    %c0_7 = arith.constant 0 : index
    %4 = vector.load %arg6[%c1, %c1_6, %c0_7] : memref<18x18x4xf32, #tpu.memory_space<vmem>>, vector<16x16x4xf32>
    tpu.vector_store %arg6[%c1, %c1_6, %c0_7], %3 {strides = array<i32>} : memref<18x18x4xf32, #tpu.memory_space<vmem>>, vector<16x16x4xf32>,
    %c0_8 = arith.constant 0 : index
    %c0_9 = arith.constant 0 : index
    %c0_10 = arith.constant 0 : index
    %5 = vector.load %arg6[%c0_8, %c0_9, %c0_10] : memref<18x18x4xf32, #tpu.memory_space<vmem>>, vector<18x18x4xf32>
    %6 = vector.extract_strided_slice %5 {offsets = [0, 0, 0], sizes = [16, 16, 4], strides = [1, 1, 1]} : vector<18x18x4xf32> to vector<16x16x4xf32>
    %7 = vector.extract_strided_slice %5 {offsets = [0, 1, 0], sizes = [16, 16, 4], strides = [1, 1, 1]} : vector<18x18x4xf32> to vector<16x16x4xf32>
    %8 = vector.extract_strided_slice %5 {offsets = [0, 2, 0], sizes = [16, 16, 4], strides = [1, 1, 1]} : vector<18x18x4xf32> to vector<16x16x4xf32>
    %9 = vector.extract_strided_slice %5 {offsets = [1, 0, 0], sizes = [16, 16, 4], strides = [1, 1, 1]} : vector<18x18x4xf32> to vector<16x16x4xf32>
    %10 = vector.extract_strided_slice %5 {offsets = [1, 1, 0], sizes = [16, 16, 4], strides = [1, 1, 1]} : vector<18x18x4xf32> to vector<16x16x4xf32>
    %11 = vector.extract_strided_slice %5 {offsets = [1, 2, 0], sizes = [16, 16, 4], strides = [1, 1, 1]} : vector<18x18x4xf32> to vector<16x16x4xf32>
    %12 = vector.extract_strided_slice %5 {offsets = [2, 0, 0], sizes = [16, 16, 4], strides = [1, 1, 1]} : vector<18x18x4xf32> to vector<16x16x4xf32>
    %13 = vector.extract_strided_slice %5 {offsets = [2, 1, 0], sizes = [16, 16, 4], strides = [1, 1, 1]} : vector<18x18x4xf32> to vector<16x16x4xf32>
    %14 = vector.extract_strided_slice %5 {offsets = [2, 2, 0], sizes = [16, 16, 4], strides = [1, 1, 1]} : vector<18x18x4xf32> to vector<16x16x4xf32>
    %15 = tpu.concatenate %6, %7, %8, %9, %10, %11, %12, %13, %14 in 2 : vector<16x16x4xf32>, vector<16x16x4xf32>, vector<16x16x4xf32>, vector<16x16x4xf32>, vector<16x16x4xf32>, vector<16x16x4xf32>, vector<16x16x4xf32>, vector<16x16x4xf32>, vector<16x16x4xf32> -> vector<16x16x36xf32>
    %c0_11 = arith.constant 0 : index
    %c0_12 = arith.constant 0 : index
    %16 = vector.load %arg3[%c0_11, %c0_12] : memref<36x128xf32, #tpu.memory_space<vmem>>, vector<36x128xf32>
    %cst_13 = arith.constant dense<0.000000e+00> : vector<16x16x128xf32>
    %17 = tpu.matmul %15, %16, %cst_13 {dimension_numbers = #tpu.dot_dimension_numbers<[2], [0], [0, 1], [1], [0, 0, 0, 1, 1, 1], [], []>} : vector<16x16x36xf32>, vector<36x128xf32>, vector<16x16x128xf32> -> vector<16x16x128xf32>
    %c0_14 = arith.constant 0 : index
    %c0_15 = arith.constant 0 : index
    %18 = vector.load %arg4[%c0_14, %c0_15] : memref<1x128xf32, #tpu.memory_space<vmem>>, vector<1x128xf32>
    %19 = vector.shape_cast %18 : vector<1x128xf32> to vector<128xf32>
    %20 = vector.shape_cast %19 : vector<128xf32> to vector<1x1x128xf32>
    %21 = vector.broadcast %20 : vector<1x1x128xf32> to vector<16x16x128xf32>
    %22 = arith.addf %17, %21 : vector<16x16x128xf32>
    %cst_16 = arith.constant 0.000000e+00 : f32
    %23 = vector.broadcast %cst_16 : f32 to vector<16x16x128xf32>
    %24 = arith.maximumf %22, %23 : vector<16x16x128xf32>
    %25 = vector.shape_cast %24 : vector<16x16x128xf32> to vector<1x16x16x128xf32>
    %c0_17 = arith.constant 0 : index
    %c0_18 = arith.constant 0 : index
    %c0_19 = arith.constant 0 : index
    %c0_20 = arith.constant 0 : index
    %26 = vector.load %arg5[%c0_17, %c0_18, %c0_19, %c0_20] : memref<1x16x16x128xf32, #tpu.memory_space<vmem>>, vector<1x16x16x128xf32>
    tpu.vector_store %arg5[%c0_17, %c0_18, %c0_19, %c0_20], %25 {strides = array<i32>} : memref<1x16x16x128xf32, #tpu.memory_space<vmem>>, vector<1x16x16x128xf32>,
    return
  }
  func.func @transform_0(%arg0: i32, %arg1: i32) -> (i32, i32, i32, i32) {
    %c0_i32 = arith.constant 0 : i32
    %c0_i32_0 = arith.constant 0 : i32
    %c0_i32_1 = arith.constant 0 : i32
    %c0_i32_2 = arith.constant 0 : i32
    return %arg0, %c0_i32, %c0_i32_0, %c0_i32_1 : i32, i32, i32, i32
  }
  func.func @transform_1(%arg0: i32, %arg1: i32) -> (i32, i32) {
    %c0_i32 = arith.constant 0 : i32
    %c0_i32_0 = arith.constant 0 : i32
    return %c0_i32, %arg1 : i32, i32
  }
  func.func @transform_2(%arg0: i32, %arg1: i32) -> (i32, i32) {
    %c0_i32 = arith.constant 0 : i32
    %c0_i32_0 = arith.constant 0 : i32
    return %c0_i32, %arg1 : i32, i32
  }
  func.func @transform_3(%arg0: i32, %arg1: i32) -> (i32, i32, i32, i32) {
    %c0_i32 = arith.constant 0 : i32
    %c0_i32_0 = arith.constant 0 : i32
    %c0_i32_1 = arith.constant 0 : i32
    return %arg0, %c0_i32, %c0_i32_0, %arg1 : i32, i32, i32, i32
  }
}

</mosaic_0001>

<bundles_post_ra>
// kernel: tpu_custom_call.1
= control target key start
LH: loop header
LB: loop body
LE: loop exit
PB: predicated region body
PF: predicated region fallthrough
CT: control target
= control target key end

     0   :  { %8 = vsyncpa [#allocation4], 0  ;;  %s4502_s0 = inlined_call_operand.vmem [shape: f32[2,16,16,4], index: 0, kind: input, shape index: {}]   ;;  %s4503_s1 = inlined_call_operand.vmem [shape: f32[36,128], index: 1, kind: input, shape index: {}]   ;;  %s4504_s2 = inlined_call_operand.vmem [shape: f32[1,128], index: 2, kind: input, shape index: {}]   ;;  %s4505_s3 = inlined_call_operand.hbm [shape: f32[2,16,16,128], index: 3, kind: output, shape index: {}]  }
   0x1   :  { %10 = vsyncpa [#allocation4 + $0x1], 0  ;;  %s2534_s12 = smov 0   ;;  %s2536_s13 = smov 0  }
   0x2   :  { %s2538_s14 = smov 0   ;;  %s2540_s15 = smov 0  }
   0x3   :  { %s2542_s16 = smov 0   ;;  %s2544_s17 = smov 0  }
   0x4 LB: > { %s2172_s18 = sadd.s32 4294967295, %s2501_s17   ;;  %s2173_s19 = sadd.s32 4294967294, %s2501_s17   ;;  %s2501_s17 = sphi %s2544_s17, %s16_s17   ;;  %s2497_s16 = sphi %s2542_s16, %s4838_s16   ;;  %s2493_s15 = sphi %s2540_s15, %s4837_s15   ;;  %s2489_s14 = sphi %s2538_s14, %s4836_s14   ;;  %s2485_s13 = sphi %s2536_s13, %s4835_s13   ;;  %s2481_s12 = sphi %s2534_s12, %s4834_s12  }
   0x5   : > { %s28_s20 = sadd.s32 1, %s2497_s16  ;;  %s115_s21 = sadd.s32 1, %s2489_s14 }
   0x6   : > { %p30_p0 = scmp.ge.s32.totalorder %s28_s20, 2  ;;  %p125_p1 = scmp.ne.s32.totalorder %s2489_s14, %s2485_s13 }
   0x7   : > { %p126_p2 = scmp.eq.s32.totalorder %s2172_s18, 1  ;;  %p131_p3 = scmp.ne.s32.totalorder %s2485_s13, %s2481_s12 }
   0x8   : > { %s4840_s20 = smov (%p30_p0, %s28_s20), 0  ;;  %p132_p5 = scmp.eq.s32.totalorder %s2173_s19, 1 }
   0x9   : > { %p2574_p4 = por %p126_p2, %p125_p1  ;;  %s110_s23 = ssub.s32 %s2497_s16, %s4840_s20 }
   0xa   : > { %p2178_p6 = scmp.ge.s32.totalorder %s2501_s17, 1  ;;  %p113_p7 = scmp.eq.s32.totalorder %s110_s23, 0 }
   0xb   : > { %p2581_p8 = por %p132_p5, %p131_p3  ;;  %p171_p9 = scmp.lt.s32.totalorder %s2501_s17, 3 }
   0xc   : > { %s2587_s25 = scalar_select %p113_p7, %s2489_s14, %s115_s21  }
   0xd   : > { %p172_p10 = pnand %p2178_p6, %p171_p9 }
   0xf   : > { %175 = sbr.rel (%p172_p10) target bundleno = 896 (0x380), region = 32 }
  0x14   : > { %vm214_vm0 = vcmask 31744   ;;  %vm217_vm1 = vcmask 25600   ;;  %p202_p11 = scmp.lt.s32.totalorder %s2493_s15, 1  ;;  %v2503_v0 = vmov 0.0   ;;  %vm437_vm2 = vcmask 1046528   ;;  %s2504_s4 = smov 4  }
  0x15   : > { %215 = vst.msk [vmem:[#allocation2] sm:$0xff] %vm214_vm0, %v2503_v0  ;;  %216 = vst.msk [vmem:[#allocation2 + $0x8] sm:$0xff] %vm214_vm0, %v2503_v0  ;;  %vm614_vm3 = vcmask 1045504   ;;  %s2505_s5 = smov 8   ;;  %s2506_s6 = smov 12   ;;  %vm1765_vm4 = vcmask 1043456  }
  0x16   : > { %219 = vst.msk [vmem:[#allocation2 + $0x18] sm:$0xff] %vm214_vm0, %v2503_v0  ;;  %220 = vst.msk [vmem:[#allocation2 + $0x20] sm:$0xff] %vm214_vm0, %v2503_v0  ;;  %s203_s26 = scalar_select %p202_p11, %s2493_s15, 1  ;;  %vm1425_vm5 = vcmask 64512   ;;  %vm1458_vm6 = vcmask 97280   ;;  %vm1491_vm7 = vcmask 130048  }
  0x17   : > { %222 = vst.msk [vmem:[#allocation2 + $0x30] sm:$0xff] %vm214_vm0, %v2503_v0  ;;  %223 = vst.msk [vmem:[#allocation2 + $0x38] sm:$0xff] %vm214_vm0, %v2503_v0  ;;  %s2507_s7 = smov 16   ;;  %s2508_s8 = smov 20   ;;  %vm1524_vm8 = vcmask 162816   ;;  %vm1557_vm9 = vcmask 195584  }
  0x18   : > { %225 = vst.msk [vmem:[#allocation2 + $0x48] sm:$0xff] %vm214_vm0, %v2503_v0  ;;  %226 = vst.msk [vmem:[#allocation2 + $0x50] sm:$0xff] %vm214_vm0, %v2503_v0  ;;  %s2221_s27 = sshll.u32 %s203_s26, 8  ;;  %s2509_s9 = smov 24   ;;  %vm1623_vm10 = vcmask 261120   ;;  %vm1590_vm11 = vcmask 228352  }
  0x19   : > { %228 = vst.msk [vmem:[#allocation2 + $0x60] sm:$0xff] %vm214_vm0, %v2503_v0  ;;  %229 = vst.msk [vmem:[#allocation2 + $0x68] sm:$0xff] %vm214_vm0, %v2503_v0  ;;  %s2650_s30 = scalar_lea.vmem %s4502_s0, %s2221_s27  ;;  %s2510_s21 = smov 28   ;;  %vm1668_vm12 = vcmask 293888  }
  0x1a   : > { %231 = vst.msk [vmem:[#allocation2 + $0x78] sm:$0xff] %vm214_vm0, %v2503_v0  ;;  %232 = vst.msk [vmem:[#allocation2 + $0x80] sm:$0xff] %vm214_vm0, %v2503_v0  ;;  %v270_v1 = vld [vmem:[%s2650_s30] sm:$0xff]  ;;  %v271_v2 = vld [vmem:[%s2650_s30 + $0x8] sm:$0xff]  ;;  %s2222_s11 = sshll.u32 %s2493_s15, 12  ;;  %s2512_s27 = smov [#allocation3]  }
  0x1b   : > { %234 = vst.msk [vmem:[#allocation2 + $0x90] sm:$0xff] %vm214_vm0, %v2503_v0  ;;  %235 = vst.msk [vmem:[#allocation2 + $0x98] sm:$0xff] %vm214_vm0, %v2503_v0  ;;  %v272_v3 = vld [vmem:[%s2650_s30 + $0x10] sm:$0xff]  ;;  %v273_v4 = vld [vmem:[%s2650_s30 + $0x18] sm:$0xff]  ;;  %s4448_s23 = scalar_lea.hbm %s4505_s3, %s2222_s11  ;;  %s2429_s28 = sshll.u32 %s2512_s27, 4  ;;  %s2430_s28 = int_to_ptr.vmem [resolvable:$false] %s2429_s28 }
  0x1c   : > { %237 = vst.msk [vmem:[#allocation2 + $0xa8] sm:$0xff] %vm214_vm0, %v2503_v0  ;;  %238 = vst.msk [vmem:[#allocation2 + $0xb0] sm:$0xff] %vm214_vm0, %v2503_v0  ;;  %v274_v5 = vld [vmem:[%s2650_s30 + $0x20] sm:$0xff]  ;;  %v275_v6 = vld [vmem:[%s2650_s30 + $0x28] sm:$0xff]  ;;  %s2431_s29 = scalar_lea.vmem %s2430_s28, 8192 }
  0x1d   : > { %240 = vst.msk [vmem:[#allocation2 + $0xc0] sm:$0xff] %vm214_vm0, %v2503_v0  ;;  %241 = vst.msk [vmem:[#allocation2 + $0xc8] sm:$0xff] %vm214_vm0, %v2503_v0  ;;  %v2661_v7 = vld [vmem:[#allocation2] sm:$0xff]  ;;  %v2663_v8 = vld [vmem:[#allocation2 + $0x8] sm:$0xff] }
  0x1e   : > { %243 = vst.msk [vmem:[#allocation2 + $0xd8] sm:$0xff] %vm214_vm0, %v2503_v0  ;;  %244 = vst.msk [vmem:[#allocation2 + $0xe0] sm:$0xff] %vm214_vm0, %v2503_v0  ;;  %v438_v10 = vrot.slane %v2661_v7, 1  ;;  %v439_v11 = vrot.slane %v2663_v8, 1  ;;  %v276_v13 = vld [vmem:[%s2650_s30 + $0x30] sm:$0xff]  ;;  %v277_v14 = vld [vmem:[%s2650_s30 + $0x38] sm:$0xff] }
  0x1f   : > { %246 = vst.msk [vmem:[#allocation2 + $0xf0] sm:$0xff] %vm214_vm0, %v2503_v0  ;;  %247 = vst.msk [vmem:[#allocation2 + $0xf8] sm:$0xff] %vm214_vm0, %v2503_v0  ;;  %v278_v15 = vld [vmem:[%s2650_s30 + $0x40] sm:$0xff]  ;;  %v279_v16 = vld [vmem:[%s2650_s30 + $0x48] sm:$0xff] }
  0x20   : > { %249 = vst.msk [vmem:[#allocation2 + $0x108] sm:$0xff] %vm214_vm0, %v2503_v0  ;;  %250 = vst.msk [vmem:[#allocation2 + $0x110] sm:$0xff] %vm214_vm0, %v2503_v0  ;;  %v280_v17 = vld [vmem:[%s2650_s30 + $0x50] sm:$0xff]  ;;  %v281_v18 = vld [vmem:[%s2650_s30 + $0x58] sm:$0xff]  ;;  %v440_v19 = vsel %vm437_vm2, %v438_v10, %v439_v11 }
  0x21   : > { %252 = vst.msk [vmem:[#allocation2 + $0x120] sm:$0xff] %vm214_vm0, %v2503_v0  ;;  %253 = vst.msk [vmem:[#allocation2 + $0x128] sm:$0xff] %vm214_vm0, %v2503_v0  ;;  %v282_v20 = vld [vmem:[%s2650_s30 + $0x60] sm:$0xff]  ;;  %v283_v21 = vld [vmem:[%s2650_s30 + $0x68] sm:$0xff]  ;;  %518 = vrot.lane.b32.xlu0 %v440_v19, %s2504_s4 }
  0x22   : > { %255 = vst.msk [vmem:[#allocation2 + $0x138] sm:$0xff] %vm214_vm0, %v2503_v0  ;;  %256 = vst.msk [vmem:[#allocation2 + $0x140] sm:$0xff] %vm214_vm0, %v2503_v0  ;;  %v284_v22 = vld [vmem:[%s2650_s30 + $0x70] sm:$0xff]  ;;  %v285_v23 = vld [vmem:[%s2650_s30 + $0x78] sm:$0xff] }
  0x23   : > { %258 = vst.msk [vmem:[#allocation2 + $0x150] sm:$0xff] %vm214_vm0, %v2503_v0  ;;  %259 = vst.msk [vmem:[#allocation2 + $0x158] sm:$0xff] %vm214_vm0, %v2503_v0  ;;  %v286_v24 = vld [vmem:[%s2650_s30 + $0x80] sm:$0xff]  ;;  %v287_v25 = vld [vmem:[%s2650_s30 + $0x88] sm:$0xff] }
  0x24   : > { %261 = vst.msk [vmem:[#allocation2 + $0x168] sm:$0xff] %vm214_vm0, %v2503_v0  ;;  %262 = vst.msk [vmem:[#allocation2 + $0x170] sm:$0xff] %vm214_vm0, %v2503_v0  ;;  %v288_v27 = vld [vmem:[%s2650_s30 + $0x90] sm:$0xff]  ;;  %v289_v28 = vld [vmem:[%s2650_s30 + $0x98] sm:$0xff] }
  0x25   : > { %264 = vst.msk [vmem:[#allocation2 + $0x180] sm:$0xff] %vm214_vm0, %v2503_v0  ;;  %265 = vst.msk [vmem:[#allocation2 + $0x188] sm:$0xff] %vm214_vm0, %v2503_v0  ;;  %v290_v29 = vld [vmem:[%s2650_s30 + $0xa0] sm:$0xff]  ;;  %v291_v60 = vld [vmem:[%s2650_s30 + $0xa8] sm:$0xff] }
  0x26   : > { %267 = vst.msk [vmem:[#allocation2 + $0x198] sm:$0xff] %vm214_vm0, %v2503_v0  ;;  %268 = vst.msk [vmem:[#allocation2 + $0x1a0] sm:$0xff] %vm214_vm0, %v2503_v0  ;;  %v295_v10 = vld [vmem:[%s2650_s30 + $0xc8] sm:$0xff] }
  0x27   : > { %218 = vst.msk [vmem:[#allocation2 + $0x10] sm:$0x3] %vm217_vm1, %v2503_v0  ;;  %221 = vst.msk [vmem:[#allocation2 + $0x28] sm:$0x3] %vm217_vm1, %v2503_v0 }
  0x28   : > { %224 = vst.msk [vmem:[#allocation2 + $0x40] sm:$0x3] %vm217_vm1, %v2503_v0  ;;  %227 = vst.msk [vmem:[#allocation2 + $0x58] sm:$0x3] %vm217_vm1, %v2503_v0 }
  0x29   : > { %230 = vst.msk [vmem:[#allocation2 + $0x70] sm:$0x3] %vm217_vm1, %v2503_v0  ;;  %233 = vst.msk [vmem:[#allocation2 + $0x88] sm:$0x3] %vm217_vm1, %v2503_v0 }
  0x2a   : > { %236 = vst.msk [vmem:[#allocation2 + $0xa0] sm:$0x3] %vm217_vm1, %v2503_v0  ;;  %239 = vst.msk [vmem:[#allocation2 + $0xb8] sm:$0x3] %vm217_vm1, %v2503_v0 }
  0x2b   : > { %242 = vst.msk [vmem:[#allocation2 + $0xd0] sm:$0x3] %vm217_vm1, %v2503_v0  ;;  %245 = vst.msk [vmem:[#allocation2 + $0xe8] sm:$0x3] %vm217_vm1, %v2503_v0 }
  0x2c   : > { %248 = vst.msk [vmem:[#allocation2 + $0x100] sm:$0x3] %vm217_vm1, %v2503_v0  ;;  %251 = vst.msk [vmem:[#allocation2 + $0x118] sm:$0x3] %vm217_vm1, %v2503_v0 }
  0x2d   : > { %254 = vst.msk [vmem:[#allocation2 + $0x130] sm:$0x3] %vm217_vm1, %v2503_v0  ;;  %257 = vst.msk [vmem:[#allocation2 + $0x148] sm:$0x3] %vm217_vm1, %v2503_v0 }
  0x2e   : > { %260 = vst.msk [vmem:[#allocation2 + $0x160] sm:$0x3] %vm217_vm1, %v2503_v0  ;;  %263 = vst.msk [vmem:[#allocation2 + $0x178] sm:$0x3] %vm217_vm1, %v2503_v0  ;;  %v2665_v9 = vld [vmem:[#allocation2 + $0x10] sm:$0x3] }
  0x2f   : > { %266 = vst.msk [vmem:[#allocation2 + $0x190] sm:$0x3] %vm217_vm1, %v2503_v0  ;;  %269 = vst.msk [vmem:[#allocation2 + $0x1a8] sm:$0x3] %vm217_vm1, %v2503_v0  ;;  %v441_v12 = vrot.slane %v2665_v9, 1 }
  0x30   : > { %303 = vst.msk [vmem:[#allocation2 + $0x19] sm:$0xff] %vm214_vm0, %v270_v1  ;;  %304 = vst.msk [vmem:[#allocation2 + $0x21] sm:$0xff] %vm214_vm0, %v271_v2  ;;  %v292_v2 = vld [vmem:[%s2650_s30 + $0xb0] sm:$0xff] }
  0x31   : > { %305 = vst.msk [vmem:[#allocation2 + $0x31] sm:$0xff] %vm214_vm0, %v272_v3  ;;  %306 = vst.msk [vmem:[#allocation2 + $0x39] sm:$0xff] %vm214_vm0, %v273_v4  ;;  %v442_v26 = vsel %vm437_vm2, %v439_v11, %v441_v12  ;;  %v293_v3 = vld [vmem:[%s2650_s30 + $0xb8] sm:$0xff]  ;;  %v294_v4 = vld [vmem:[%s2650_s30 + $0xc0] sm:$0xff] }
  0x32   : > { %307 = vst.msk [vmem:[#allocation2 + $0x49] sm:$0xff] %vm214_vm0, %v274_v5  ;;  %308 = vst.msk [vmem:[#allocation2 + $0x51] sm:$0xff] %vm214_vm0, %v275_v6  ;;  %520 = vrot.lane.b32.xlu0 %v442_v26, %s2504_s4  ;;  %v296_v11 = vld [vmem:[%s2650_s30 + $0xd0] sm:$0xff]  ;;  %v297_v12 = vld [vmem:[%s2650_s30 + $0xd8] sm:$0xff] }
  0x33   : > { %309 = vst.msk [vmem:[#allocation2 + $0x61] sm:$0xff] %vm214_vm0, %v276_v13  ;;  %310 = vst.msk [vmem:[#allocation2 + $0x69] sm:$0xff] %vm214_vm0, %v277_v14  ;;  %v298_v14 = vld [vmem:[%s2650_s30 + $0xe0] sm:$0xff] }
  0x34   : > { %311 = vst.msk [vmem:[#allocation2 + $0x79] sm:$0xff] %vm214_vm0, %v278_v15  ;;  %312 = vst.msk [vmem:[#allocation2 + $0x81] sm:$0xff] %vm214_vm0, %v279_v16  ;;  %v299_v15 = vld [vmem:[%s2650_s30 + $0xe8] sm:$0xff] }
  0x35   : > { %313 = vst.msk [vmem:[#allocation2 + $0x91] sm:$0xff] %vm214_vm0, %v280_v17  ;;  %314 = vst.msk [vmem:[#allocation2 + $0x99] sm:$0xff] %vm214_vm0, %v281_v18 }
  0x36   : > { %315 = vst.msk [vmem:[#allocation2 + $0xa9] sm:$0xff] %vm214_vm0, %v282_v20  ;;  %316 = vst.msk [vmem:[#allocation2 + $0xb1] sm:$0xff] %vm214_vm0, %v283_v21 }
  0x37   : > { %317 = vst.msk [vmem:[#allocation2 + $0xc1] sm:$0xff] %vm214_vm0, %v284_v22  ;;  %318 = vst.msk [vmem:[#allocation2 + $0xc9] sm:$0xff] %vm214_vm0, %v285_v23  ;;  %v2703_v30 = vld [vmem:[#allocation2 + $0x18] sm:$0xff]  ;;  %v2705_v31 = vld [vmem:[#allocation2 + $0x20] sm:$0xff] }
  0x38   : > { %319 = vst.msk [vmem:[#allocation2 + $0xd9] sm:$0xff] %vm214_vm0, %v286_v24  ;;  %320 = vst.msk [vmem:[#allocation2 + $0xe1] sm:$0xff] %vm214_vm0, %v287_v25  ;;  %v2707_v32 = vld [vmem:[#allocation2 + $0x30] sm:$0xff]  ;;  %v443_v33 = vrot.slane %v2703_v30, 1  ;;  %v444_v34 = vrot.slane %v2705_v31, 1  ;;  %v2714_v35 = vld [vmem:[#allocation2 + $0x38] sm:$0xff] }
  0x39   : > { %321 = vst.msk [vmem:[#allocation2 + $0xf1] sm:$0xff] %vm214_vm0, %v288_v27  ;;  %322 = vst.msk [vmem:[#allocation2 + $0xf9] sm:$0xff] %vm214_vm0, %v289_v28  ;;  %v448_v36 = vrot.slane %v2707_v32, 1  ;;  %v2717_v37 = vld [vmem:[#allocation2 + $0x28] sm:$0x3]  ;;  %v449_v38 = vrot.slane %v2714_v35, 1 }
  0x3a   : > { %323 = vst.msk [vmem:[#allocation2 + $0x109] sm:$0xff] %vm214_vm0, %v290_v29  ;;  %v446_v39 = vrot.slane %v2717_v37, 1  ;;  %v2722_v40 = vld [vmem:[#allocation2 + $0x48] sm:$0xff]  ;;  %v2724_v41 = vld [vmem:[#allocation2 + $0x50] sm:$0xff]  ;;  %v2726_v42 = vld [vmem:[#allocation2 + $0x40] sm:$0x3]  ;;  %v2729_v43 = vsel %vm437_vm2, %v443_v33, %v444_v34 }
  0x3b   : > { %v453_v44 = vrot.slane %v2722_v40, 1  ;;  %v454_v45 = vrot.slane %v2724_v41, 1  ;;  %522 = vrot.lane.b32.xlu1 %v2729_v43, %s2504_s4  ;;  %v2736_v46 = vsel %vm437_vm2, %v448_v36, %v449_v38  ;;  %v2738_v47 = vld [vmem:[#allocation2 + $0x60] sm:$0xff]  ;;  %v2740_v48 = vld [vmem:[#allocation2 + $0x68] sm:$0xff]  ;;  %v451_v50 = vrot.slane %v2726_v42, 1  ;;  %v2757_v55 = vld [vmem:[#allocation2 + $0x78] sm:$0xff] }
  0x3c   : > { %v2743_v49 = vsel %vm437_vm2, %v444_v34, %v446_v39  ;;  %526 = vrot.lane.b32.xlu0 %v2736_v46, %s2504_s4  ;;  %v2748_v51 = vld [vmem:[#allocation2 + $0x58] sm:$0x3]  ;;  %v458_v53 = vrot.slane %v2738_v47, 1  ;;  %v459_v54 = vrot.slane %v2740_v48, 1  ;;  %v2759_v56 = vld [vmem:[#allocation2 + $0x80] sm:$0xff]  ;;  %v463_v62 = vrot.slane %v2757_v55, 1 }
  0x3d   : > { %v2751_v52 = vsel %vm437_vm2, %v453_v44, %v454_v45  ;;  %v2762_v57 = vsel %vm437_vm2, %v449_v38, %v451_v50  ;;  %v456_v58 = vrot.slane %v2748_v51, 1  ;;  %v2767_v59 = vld [vmem:[#allocation2 + $0x70] sm:$0x3]  ;;  %v464_v63 = vrot.slane %v2759_v56, 1  ;;  %v2777_v1 = vld [vmem:[#allocation2 + $0x98] sm:$0xff]  ;;  %324 = vst.msk [vmem:[#allocation2 + $0x111] sm:$0xff] %vm214_vm0, %v291_v60 }
  0x3e   : > { %4591 = vst [vmem:[#allocation6_spill] sm:$0xff] %v2751_v52  ;;  %4592 = vst [vmem:[#allocation7_spill] sm:$0xff] %v2762_v57  ;;  %v2771_v61 = vsel %vm437_vm2, %v458_v53, %v459_v54  ;;  %v2775_v0 = vld [vmem:[#allocation2 + $0x90] sm:$0xff]  ;;  %v461_v6 = vrot.slane %v2767_v59, 1  ;;  %v2797_v13 = vld [vmem:[#allocation2 + $0x88] sm:$0x3] }
  0x3f   : > { %524 = vrot.lane.b32.xlu1 %v2743_v49, %s2504_s4  ;;  %4593 = vst [vmem:[#allocation8_spill] sm:$0xff] %v2771_v61  ;;  %v2786_v5 = vsel %vm437_vm2, %v454_v45, %v456_v58  ;;  %325 = vst.msk [vmem:[#allocation2 + $0x121] sm:$0xff] %vm214_vm0, %v292_v2  ;;  %v2805_v16 = vsel %vm437_vm2, %v463_v62, %v464_v63  ;;  %v468_v17 = vrot.slane %v2775_v0, 1  ;;  %v469_v18 = vrot.slane %v2777_v1, 1  ;;  %v2813_v19 = vld [vmem:[#allocation2 + $0xa8] sm:$0xff]  ;;  %v2815_v20 = vld [vmem:[#allocation2 + $0xb0] sm:$0xff] }
  0x40   : > { %530 = vrot.lane.b32.xlu0 %v2751_v52, %s2504_s4  ;;  %4594 = vst [vmem:[#allocation9_spill] sm:$0xff] %v2786_v5  ;;  %326 = vst.msk [vmem:[#allocation2 + $0x129] sm:$0xff] %vm214_vm0, %v293_v3  ;;  %v2818_v21 = vsel %vm437_vm2, %v459_v54, %v461_v6  ;;  %v466_v22 = vrot.slane %v2797_v13, 1  ;;  %v2823_v23 = vld [vmem:[#allocation2 + $0xa0] sm:$0x3]  ;;  %v473_v25 = vrot.slane %v2813_v19, 1 }
  0x41   : > { %327 = vst.msk [vmem:[#allocation2 + $0x139] sm:$0xff] %vm214_vm0, %v294_v4  ;;  %328 = vst.msk [vmem:[#allocation2 + $0x141] sm:$0xff] %vm214_vm0, %v295_v10  ;;  %v2826_v24 = vsel %vm437_vm2, %v468_v17, %v469_v18  ;;  %v474_v26 = vrot.slane %v2815_v20, 1  ;;  %v2832_v27 = vld [vmem:[#allocation2 + $0xc0] sm:$0xff]  ;;  %v2834_v28 = vld [vmem:[#allocation2 + $0xc8] sm:$0xff]  ;;  %v471_v33 = vrot.slane %v2823_v23, 1 }
  0x42   : > { %329 = vst.msk [vmem:[#allocation2 + $0x151] sm:$0xff] %vm214_vm0, %v296_v11  ;;  %330 = vst.msk [vmem:[#allocation2 + $0x159] sm:$0xff] %vm214_vm0, %v297_v12  ;;  %v2837_v29 = vsel %vm437_vm2, %v464_v63, %v466_v22  ;;  %v2842_v34 = vld [vmem:[#allocation2 + $0xb8] sm:$0x3]  ;;  %v478_v38 = vrot.slane %v2832_v27, 1  ;;  %v479_v39 = vrot.slane %v2834_v28, 1 }
  0x43   : > { %528 = vrot.lane.b32.xlu1 %v2762_v57, %s2504_s4  ;;  %4595 = vst [vmem:[#allocation10_spill] sm:$0xff] %v2805_v16  ;;  %331 = vst.msk [vmem:[#allocation2 + $0x169] sm:$0xff] %vm214_vm0, %v298_v14  ;;  %v2845_v36 = vsel %vm437_vm2, %v473_v25, %v474_v26  ;;  %v2851_v44 = vld [vmem:[#allocation2 + $0xd8] sm:$0xff]  ;;  %v2853_v45 = vld [vmem:[#allocation2 + $0xe0] sm:$0xff]  ;;  %v2856_v50 = vsel %vm437_vm2, %v469_v18, %v471_v33  ;;  %v476_v53 = vrot.slane %v2842_v34, 1  ;;  %v616_v57 = vrot.slane %v2663_v8, 2 }
  0x44   : > { %534 = vrot.lane.b32.xlu0 %v2771_v61, %s2504_s4  ;;  %332 = vst.msk [vmem:[#allocation2 + $0x171] sm:$0xff] %vm214_vm0, %v299_v15  ;;  %4596 = vst [vmem:[#allocation11_spill] sm:$0xff] %v2818_v21  ;;  %v2861_v54 = vld [vmem:[#allocation2 + $0xd0] sm:$0x3]  ;;  %v2864_v58 = vsel %vm437_vm2, %v478_v38, %v479_v39  ;;  %v483_v60 = vrot.slane %v2851_v44, 1  ;;  %v484_v62 = vrot.slane %v2853_v45, 1 }
  0x45   : > { %4597 = vst [vmem:[#allocation12_spill] sm:$0xff] %v2826_v24  ;;  %4598 = vst [vmem:[#allocation13_spill] sm:$0xff] %v2837_v29  ;;  %v2870_v63 = vld [vmem:[#allocation2 + $0xf0] sm:$0xff]  ;;  %v2872_v2 = vld [vmem:[#allocation2 + $0xf8] sm:$0xff]  ;;  %v2875_v3 = vsel %vm437_vm2, %v474_v26, %v476_v53  ;;  %v481_v4 = vrot.slane %v2861_v54, 1  ;;  %v621_v8 = vrot.slane %v2705_v31, 2 }
  0x46   : > { %4599 = vst [vmem:[#allocation14_spill] sm:$0xff] %v2845_v36  ;;  %4600 = vst [vmem:[#allocation15_spill] sm:$0xff] %v2856_v50  ;;  %v2880_v6 = vld [vmem:[#allocation2 + $0xe8] sm:$0x3]  ;;  %v2883_v10 = vsel %vm437_vm2, %v483_v60, %v484_v62  ;;  %v488_v11 = vrot.slane %v2870_v63, 1  ;;  %v489_v12 = vrot.slane %v2872_v2, 1 }
  0x47   : > { %532 = vrot.lane.b32.xlu1 %v2786_v5, %s2504_s4  ;;  %4601 = vst [vmem:[#allocation16_spill] sm:$0xff] %v2864_v58  ;;  %4602 = vst [vmem:[#allocation17_spill] sm:$0xff] %v2875_v3  ;;  %v2889_v14 = vld [vmem:[#allocation2 + $0x108] sm:$0xff]  ;;  %v2891_v15 = vld [vmem:[#allocation2 + $0x110] sm:$0xff]  ;;  %v2894_v17 = vsel %vm437_vm2, %v479_v39, %v481_v4  ;;  %v486_v18 = vrot.slane %v2880_v6, 1 }
  0x48   : > { %538 = vrot.lane.b32.xlu0 %v2805_v16, %s2504_s4  ;;  %4603 = vst [vmem:[#allocation18_spill] sm:$0xff] %v2883_v10  ;;  %4604 = vst [vmem:[#allocation19_spill] sm:$0xff] %v2894_v17  ;;  %v2899_v22 = vld [vmem:[#allocation2 + $0x100] sm:$0x3]  ;;  %v2902_v25 = vsel %vm437_vm2, %v488_v11, %v489_v12  ;;  %v493_v26 = vrot.slane %v2889_v14, 1  ;;  %v494_v33 = vrot.slane %v2891_v15, 1 }
  0x49   : > { %4605 = vst [vmem:[#allocation20_spill] sm:$0xff] %v2902_v25  ;;  %v2908_v38 = vld [vmem:[#allocation2 + $0x120] sm:$0xff]  ;;  %v2910_v39 = vld [vmem:[#allocation2 + $0x128] sm:$0xff]  ;;  %v2913_v53 = vsel %vm437_vm2, %v484_v62, %v486_v18  ;;  %v491_v60 = vrot.slane %v2899_v22, 1  ;;  %v2918_v4 = vld [vmem:[#allocation2 + $0x118] sm:$0x3] }
  0x4a   : > { %4606 = vst [vmem:[#allocation21_spill] sm:$0xff] %v2913_v53  ;;  %v2921_v11 = vsel %vm437_vm2, %v493_v26, %v494_v33  ;;  %v2929_v62 = vld [vmem:[#allocation2 + $0x140] sm:$0xff]  ;;  %v2937_v26 = vld [vmem:[#allocation2 + $0x130] sm:$0x3]  ;;  %v301_v52 = vld [vmem:[%s2650_s30 + $0xf8] sm:$0xff] }
  0x4b   : > { %536 = vrot.lane.b32.xlu1 %v2818_v21, %s2504_s4  ;;  %4607 = vst [vmem:[#allocation22_spill] sm:$0xff] %v2921_v11  ;;  %v2932_v18 = vsel %vm437_vm2, %v489_v12, %v491_v60  ;;  %v2946_v12 = vld [vmem:[#allocation2 + $0x150] sm:$0xff]  ;;  %v2948_v60 = vld [vmem:[#allocation2 + $0x158] sm:$0xff]  ;;  %v2965_v21 = vld [vmem:[#allocation2 + $0x168] sm:$0xff] }
  0x4c   : > { %542 = vrot.lane.b32.xlu0 %v2826_v24, %s2504_s4  ;;  %4608 = vst [vmem:[#allocation23_spill] sm:$0xff] %v2932_v18  ;;  %v508_v24 = vrot.slane %v2946_v12, 1  ;;  %v300_v16 = vld [vmem:[%s2650_s30 + $0xf0] sm:$0xff]  ;;  %v513_v5 = vrot.slane %v2965_v21, 1  ;;  %334 = vst.msk [vmem:[#allocation2 + $0x189] sm:$0xff] %vm214_vm0, %v301_v52  ;;  %v618_v52 = vrot.slane %v2665_v9, 2 }
  0x4d   : > { %333 = vst.msk [vmem:[#allocation2 + $0x181] sm:$0xff] %vm214_vm0, %v300_v16 }
  0x4f   : > { %540 = vrot.lane.b32.xlu1 %v2837_v29, %s2504_s4 }
  0x50   : > { %546 = vrot.lane.b32.xlu0 %v2845_v36, %s2504_s4 }
  0x53   : > { %544 = vrot.lane.b32.xlu1 %v2856_v50, %s2504_s4 }
  0x54   : > { %550 = vrot.lane.b32.xlu0 %v2864_v58, %s2504_s4  ;;  %v498_v58 = vrot.slane %v2908_v38, 1 }
  0x57   : > { %548 = vrot.lane.b32.xlu1 %v2875_v3, %s2504_s4  ;;  %v2927_v3 = vld [vmem:[#allocation2 + $0x138] sm:$0xff] }
  0x58   : > { %554 = vrot.lane.b32.xlu0 %v2883_v10, %s2504_s4  ;;  %v503_v50 = vrot.slane %v2927_v3, 1 }
  0x5b   : > { %552 = vrot.lane.b32.xlu1 %v2894_v17, %s2504_s4  ;;  %v499_v17 = vrot.slane %v2910_v39, 1 }
  0x5c   : > { %558 = vrot.lane.b32.xlu0 %v2902_v25, %s2504_s4  ;;  %v496_v25 = vrot.slane %v2918_v4, 1 }
  0x5d   : > { %v2940_v10 = vsel %vm437_vm2, %v498_v58, %v499_v17  ;;  %v2956_v58 = vld [vmem:[#allocation2 + $0x148] sm:$0x3] }
  0x5e   : > { %4609 = vst [vmem:[#allocation24_spill] sm:$0xff] %v2940_v10  ;;  %v2951_v36 = vsel %vm437_vm2, %v494_v33, %v496_v25  ;;  %v2967_v25 = vld [vmem:[#allocation2 + $0x170] sm:$0xff] }
  0x5f   : > { %556 = vrot.lane.b32.xlu1 %v2913_v53, %s2504_s4  ;;  %v504_v53 = vrot.slane %v2929_v62, 1  ;;  %4610 = vst [vmem:[#allocation25_spill] sm:$0xff] %v2951_v36  ;;  %v514_v61 = vrot.slane %v2967_v25, 1 }
  0x60   : > { %562 = vrot.lane.b32.xlu0 %v2921_v11, %s2504_s4  ;;  %v501_v11 = vrot.slane %v2937_v26, 1 }
  0x61   : > { %v2959_v29 = vsel %vm437_vm2, %v503_v50, %v504_v53  ;;  %v2976_v50 = vld [vmem:[#allocation2 + $0x160] sm:$0x3]  ;;  %v2995_v16 = vsel %vm437_vm2, %v513_v5, %v514_v61 }
  0x62   : > { %4611 = vst [vmem:[#allocation26_spill] sm:$0xff] %v2959_v29  ;;  %v2970_v33 = vsel %vm437_vm2, %v499_v17, %v501_v11  ;;  %v511_v11 = vrot.slane %v2976_v50, 1  ;;  %4614 = vst [vmem:[#allocation29_spill] sm:$0xff] %v2995_v16 }
  0x63   : > { %560 = vrot.lane.b32.xlu1 %v2932_v18, %s2504_s4  ;;  %v509_v18 = vrot.slane %v2948_v60, 1 }
  0x64   : > { %566 = vrot.lane.b32.xlu0 %v2940_v10, %s2504_s4  ;;  %v506_v10 = vrot.slane %v2956_v58, 1 }
  0x66   : > { %v2987_v17 = vsel %vm437_vm2, %v504_v53, %v506_v10  ;;  %v3004_v10 = vsel %vm437_vm2, %v509_v18, %v511_v11  ;;  %v625_v11 = vrot.slane %v2707_v32, 2 }
  0x67   : > { %564 = vrot.lane.b32.xlu1 %v2951_v36, %s2504_s4  ;;  %v2980_v36 = vsel %vm437_vm2, %v508_v24, %v509_v18  ;;  %4613 = vst [vmem:[#allocation28_spill] sm:$0xff] %v2987_v17  ;;  %v615_v24 = vrot.slane %v2661_v7, 2  ;;  %4615 = vst [vmem:[#allocation30_spill] sm:$0xff] %v3004_v10  ;;  %v620_v7 = vrot.slane %v2703_v30, 2 }
  0x68   : > { %570 = vrot.lane.b32.xlu0 %v2959_v29, %s2504_s4  ;;  %4612 = vst [vmem:[#allocation27_spill] sm:$0xff] %v2980_v36  ;;  %v2992_v29 = vld [vmem:[#allocation2 + $0x178] sm:$0x3] }
  0x69   : > { %v516_v53 = vrot.slane %v2992_v29, 1  ;;  %v617_v5 = vsel %vm614_vm3, %v615_v24, %v616_v57  ;;  %v3020_v18 = vsel %vm614_vm3, %v620_v7, %v621_v8  ;;  %v626_v24 = vrot.slane %v2714_v35, 2 }
  0x6b   : > { %568 = vrot.lane.b32.xlu1 %v2970_v33, %s2504_s4  ;;  %v3031_v9 = vsel %vm614_vm3, %v625_v11, %v626_v24  ;;  %v640_v11 = vrot.slane %v2757_v55, 2 }
  0x6c   : > { %574 = vrot.lane.b32.xlu0 %v2980_v36, %s2504_s4  ;;  %v3015_v36 = vsel %vm437_vm2, %v514_v61, %v516_v53  ;;  %v623_v61 = vrot.slane %v2717_v37, 2  ;;  %v630_v53 = vrot.slane %v2722_v40, 2 }
  0x6d   : > { %4616 = vst [vmem:[#allocation31_spill] sm:$0xff] %v3015_v36 }
  0x6e   : > { %v3037_v7 = vsel %vm614_vm3, %v621_v8, %v623_v61  ;;  %v633_v8 = vrot.slane %v2748_v51, 2  ;;  %v641_v61 = vrot.slane %v2759_v56, 2 }
  0x6f   : > { %572 = vrot.lane.b32.xlu1 %v2987_v17, %s2504_s4 }
  0x70   : > { %578 = vrot.lane.b32.xlu0 %v2995_v16, %s2504_s4  ;;  %v619_v16 = vsel %vm614_vm3, %v616_v57, %v618_v52  ;;  %v635_v57 = vrot.slane %v2738_v47, 2  ;;  %v636_v52 = vrot.slane %v2740_v48, 2  ;;  %v3069_v51 = vsel %vm614_vm3, %v640_v11, %v641_v61 }
  0x71   : > { %4617 = vst [vmem:[#allocation32_spill] sm:$0xff] %v3069_v51  ;;  %v651_v11 = vrot.slane %v2815_v20, 2 }
  0x73   : > { %576 = vrot.lane.b32.xlu1 %v3004_v10, %s2504_s4 }
  0x74   : > { %695 = vrot.lane.b32.xlu0 %v617_v5, %s2505_s5  ;;  %v631_v5 = vrot.slane %v2724_v41, 2 }
  0x76   : > { %v3043_v37 = vsel %vm614_vm3, %v630_v53, %v631_v5  ;;  %v3063_v53 = vsel %vm614_vm3, %v631_v5, %v633_v8  ;;  %v643_v5 = vrot.slane %v2797_v13, 2  ;;  %v650_v8 = vrot.slane %v2813_v19, 2 }
  0x77   : > { %580 = vrot.lane.b32.xlu1 %v3015_v36, %s2504_s4  ;;  %v628_v36 = vrot.slane %v2726_v42, 2  ;;  %v3056_v42 = vsel %vm614_vm3, %v635_v57, %v636_v52  ;;  %v646_v57 = vrot.slane %v2777_v1, 2  ;;  %s2511_s4 = smov 32  }
  0x78   : > { %699 = vrot.lane.b32.xlu0 %v3020_v18, %s2505_s5  ;;  %v3089_v17 = vsel %vm614_vm3, %v641_v61, %v643_v5  ;;  %v3095_v13 = vsel %vm614_vm3, %v650_v8, %v651_v11  ;;  %v653_v61 = vrot.slane %v2842_v34, 2  ;;  %v660_v5 = vrot.slane %v2851_v44, 2 }
  0x79   : > { %4620 = vst [vmem:[#allocation35_spill] sm:$0xff] %v3089_v17  ;;  %4621 = vst [vmem:[#allocation36_spill] sm:$0xff] %v3095_v13  ;;  %v661_v8 = vrot.slane %v2853_v45, 2 }
  0x7b   : > { %697 = vrot.lane.b32.xlu1 %v619_v16, %s2505_s5  ;;  %v3050_v16 = vsel %vm614_vm3, %v626_v24, %v628_v36  ;;  %v638_v36 = vrot.slane %v2767_v59, 2  ;;  %v645_v24 = vrot.slane %v2775_v0, 2  ;;  %v3121_v34 = vsel %vm614_vm3, %v660_v5, %v661_v8 }
  0x7c   : > { %703 = vrot.lane.b32.xlu0 %v3031_v9, %s2505_s5  ;;  %4625 = vst [vmem:[#allocation40_spill] sm:$0xff] %v3121_v34  ;;  %v671_v5 = vrot.slane %v2891_v15, 2 }
  0x7d   : > { %v3076_v10 = vsel %vm614_vm3, %v636_v52, %v638_v36  ;;  %v3082_v59 = vsel %vm614_vm3, %v645_v24, %v646_v57  ;;  %v648_v52 = vrot.slane %v2823_v23, 2  ;;  %v655_v36 = vrot.slane %v2832_v27, 2 }
  0x7e   : > { %4618 = vst [vmem:[#allocation33_spill] sm:$0xff] %v3076_v10  ;;  %4619 = vst [vmem:[#allocation34_spill] sm:$0xff] %v3082_v59  ;;  %v656_v24 = vrot.slane %v2834_v28, 2 }
  0x7f   : > { %701 = vrot.lane.b32.xlu1 %v3037_v7, %s2505_s5 }
  0x80   : > { %707 = vrot.lane.b32.xlu0 %v3043_v37, %s2505_s5  ;;  %v3108_v23 = vsel %vm614_vm3, %v655_v36, %v656_v24  ;;  %v666_v36 = vrot.slane %v2872_v2, 2 }
  0x81   : > { %4623 = vst [vmem:[#allocation38_spill] sm:$0xff] %v3108_v23 }
  0x83   : > { %705 = vrot.lane.b32.xlu1 %v3050_v16, %s2505_s5 }
  0x84   : > { %711 = vrot.lane.b32.xlu0 %v3056_v42, %s2505_s5 }
  0x87   : > { %709 = vrot.lane.b32.xlu1 %v3063_v53, %s2505_s5 }
  0x88   : > { %715 = vrot.lane.b32.xlu0 %v3069_v51, %s2505_s5  ;;  %v3102_v51 = vsel %vm614_vm3, %v646_v57, %v648_v52  ;;  %v658_v57 = vrot.slane %v2861_v54, 2  ;;  %v665_v52 = vrot.slane %v2870_v63, 2 }
  0x89   : > { %4622 = vst [vmem:[#allocation37_spill] sm:$0xff] %v3102_v51 }
  0x8a   : > { %v3134_v54 = vsel %vm614_vm3, %v665_v52, %v666_v36  ;;  %v676_v52 = vrot.slane %v2910_v39, 2 }
  0x8b   : > { %713 = vrot.lane.b32.xlu1 %v3076_v10, %s2505_s5 }
  0x8c   : > { %719 = vrot.lane.b32.xlu0 %v3082_v59, %s2505_s5  ;;  %v3115_v59 = vsel %vm614_vm3, %v651_v11, %v653_v61  ;;  %v663_v11 = vrot.slane %v2880_v6, 2  ;;  %v670_v61 = vrot.slane %v2889_v14, 2 }
  0x8d   : > { %4624 = vst [vmem:[#allocation39_spill] sm:$0xff] %v3115_v59 }
  0x8e   : > { %v3147_v6 = vsel %vm614_vm3, %v670_v61, %v671_v5  ;;  %v681_v61 = vrot.slane %v2929_v62, 2 }
  0x8f   : > { %717 = vrot.lane.b32.xlu1 %v3089_v17, %s2505_s5  ;;  %v691_v17 = vrot.slane %v2967_v25, 2 }
  0x90   : > { %723 = vrot.lane.b32.xlu0 %v3095_v13, %s2505_s5  ;;  %v3128_v13 = vsel %vm614_vm3, %v656_v24, %v658_v57  ;;  %v668_v24 = vrot.slane %v2899_v22, 2  ;;  %v675_v57 = vrot.slane %v2908_v38, 2 }
  0x91   : > { %4626 = vst [vmem:[#allocation41_spill] sm:$0xff] %v3128_v13 }
  0x92   : > { %v3160_v22 = vsel %vm614_vm3, %v675_v57, %v676_v52  ;;  %v686_v57 = vrot.slane %v2948_v60, 2 }
  0x93   : > { %721 = vrot.lane.b32.xlu1 %v3102_v51, %s2505_s5  ;;  %v3177_v51 = vpop.permute.xlu0 %518 }
  0x94   : > { %727 = vrot.lane.b32.xlu0 %v3108_v23, %s2505_s5  ;;  %v3141_v23 = vsel %vm614_vm3, %v661_v8, %v663_v11  ;;  %v673_v8 = vrot.slane %v2918_v4, 2  ;;  %v680_v11 = vrot.slane %v2927_v3, 2  ;;  %4628 = vst [vmem:[#allocation43_spill] sm:$0xff] %v3177_v51 }
  0x95   : > { %4627 = vst [vmem:[#allocation42_spill] sm:$0xff] %v3141_v23 }
  0x96   : > { %v3173_v4 = vsel %vm614_vm3, %v680_v11, %v681_v61  ;;  %v690_v11 = vrot.slane %v2965_v21, 2 }
  0x97   : > { %725 = vrot.lane.b32.xlu1 %v3115_v59, %s2505_s5  ;;  %v3167_v59 = vsel %vm614_vm3, %v671_v5, %v673_v8 }
  0x98   : > { %731 = vrot.lane.b32.xlu0 %v3121_v34, %s2505_s5 }
  0x9b   : > { %729 = vrot.lane.b32.xlu1 %v3128_v13, %s2505_s5  ;;  %v3154_v13 = vsel %vm614_vm3, %v666_v36, %v668_v24  ;;  %v678_v36 = vrot.slane %v2937_v26, 2  ;;  %v685_v24 = vrot.slane %v2946_v12, 2  ;;  %v683_v26 = vrot.slane %v2956_v58, 2 }
  0x9c   : > { %735 = vrot.lane.b32.xlu0 %v3134_v54, %s2505_s5  ;;  %v688_v58 = vrot.slane %v2976_v50, 2 }
  0x9d   : > { %v3182_v5 = vsel %vm614_vm3, %v676_v52, %v678_v36  ;;  %v3188_v8 = vsel %vm614_vm3, %v685_v24, %v686_v57  ;;  %v3197_v52 = vsel %vm614_vm3, %v681_v61, %v683_v26  ;;  %v3205_v24 = vsel %vm614_vm3, %v690_v11, %v691_v17 }
  0x9e   : > { %4630 = vst [vmem:[#allocation45_spill] sm:$0xff] %v3205_v24  ;;  %v693_v61 = vrot.slane %v2992_v29, 2 }
  0x9f   : > { %733 = vrot.lane.b32.xlu1 %v3141_v23, %s2505_s5 }
  0xa0   : > { %739 = vrot.lane.b32.xlu0 %v3147_v6, %s2505_s5  ;;  %v3224_v11 = vsel %vm614_vm3, %v691_v17, %v693_v61 }
  0xa1   : > { %4635 = vst [vmem:[#allocation50_spill] sm:$0xff] %v3224_v11 }
  0xa3   : > { %737 = vrot.lane.b32.xlu1 %v3154_v13, %s2505_s5 }
  0xa4   : > { %743 = vrot.lane.b32.xlu0 %v3160_v22, %s2505_s5  ;;  %v3192_v10 = vpop.permute.xlu0 %520 }
  0xa5   : > { %4629 = vst [vmem:[#allocation44_spill] sm:$0xff] %v3192_v10  ;;  %v3212_v10 = vsel %vm614_vm3, %v686_v57, %v688_v58 }
  0xa6   : > { %4632 = vst [vmem:[#allocation47_spill] sm:$0xff] %v3212_v10 }
  0xa7   : > { %741 = vrot.lane.b32.xlu1 %v3167_v59, %s2505_s5 }
  0xa8   : > { %747 = vrot.lane.b32.xlu0 %v3173_v4, %s2505_s5 }
  0xab   : > { %745 = vrot.lane.b32.xlu1 %v3182_v5, %s2505_s5 }
  0xac   : > { %751 = vrot.lane.b32.xlu0 %v3188_v8, %s2505_s5 }
  0xad   : > { %v3202_v36 = vpop.permute.xlu1 %522 }
  0xae   : > { %v3207_v51 = vpop.permute.xlu0 %526 }
  0xaf   : > { %4631 = vst [vmem:[#allocation46_spill] sm:$0xff] %v3207_v51  ;;  %749 = vrot.lane.b32.xlu1 %v3197_v52, %s2505_s5  ;;  %v4682_v51 = vld [vmem:[#allocation14_spill] sm:$0xff] }
  0xb0   : > { %755 = vrot.lane.b32.xlu0 %v3205_v24, %s2505_s5 }
  0xb1   : > { %v3217_v50 = vpop.permute.xlu1 %524 }
  0xb2   : > { %4633 = vst [vmem:[#allocation48_spill] sm:$0xff] %v3217_v50  ;;  %v3219_v26 = vpop.permute.xlu0 %530  ;;  %v4689_v50 = vld [vmem:[#allocation21_spill] sm:$0xff] }
  0xb3   : > { %4634 = vst [vmem:[#allocation49_spill] sm:$0xff] %v3219_v26  ;;  %753 = vrot.lane.b32.xlu1 %v3212_v10, %s2505_s5  ;;  %v4685_v10 = vld [vmem:[#allocation18_spill] sm:$0xff] }
  0xb4   : > { %793 = vrot.lane.b32.xlu0 %v2703_v30, %s2506_s6 }
  0xb5   : > { %v3228_v57 = vpop.permute.xlu1 %528 }
  0xb6   : > { %4636 = vst [vmem:[#allocation51_spill] sm:$0xff] %v3228_v57  ;;  %v3230_v29 = vpop.permute.xlu0 %534  ;;  %v4679_v57 = vld [vmem:[#allocation12_spill] sm:$0xff] }
  0xb7   : > { %4637 = vst [vmem:[#allocation52_spill] sm:$0xff] %v3230_v29  ;;  %757 = vrot.lane.b32.xlu1 %v3224_v11, %s2505_s5 }
  0xb8   : > { %797 = vrot.lane.b32.xlu0 %v2707_v32, %s2506_s6 }
  0xb9   : > { %v3236_v58 = vpop.permute.xlu1 %532 }
  0xba   : > { %4638 = vst [vmem:[#allocation53_spill] sm:$0xff] %v3236_v58  ;;  %v3238_v26 = vpop.permute.xlu0 %538 }
  0xbb   : > { %4639 = vst [vmem:[#allocation54_spill] sm:$0xff] %v3238_v26  ;;  %795 = vrot.lane.b32.xlu1 %v2705_v31, %s2506_s6 }
  0xbc   : > { %801 = vrot.lane.b32.xlu0 %v2722_v40, %s2506_s6 }
  0xbd   : > { %v3244_v30 = vpop.permute.xlu1 %536 }
  0xbe   : > { %4640 = vst [vmem:[#allocation55_spill] sm:$0xff] %v3244_v30  ;;  %v3246_v17 = vpop.permute.xlu0 %542 }
  0xbf   : > { %4641 = vst [vmem:[#allocation56_spill] sm:$0xff] %v3246_v17  ;;  %799 = vrot.lane.b32.xlu1 %v2714_v35, %s2506_s6 }
  0xc0   : > { %805 = vrot.lane.b32.xlu0 %v2738_v47, %s2506_s6 }
  0xc1   : > { %v3252_v61 = vpop.permute.xlu1 %540 }
  0xc2   : > { %4642 = vst [vmem:[#allocation57_spill] sm:$0xff] %v3252_v61  ;;  %v3254_v29 = vpop.permute.xlu0 %546 }
  0xc3   : > { %4643 = vst [vmem:[#allocation58_spill] sm:$0xff] %v3254_v29  ;;  %803 = vrot.lane.b32.xlu1 %v2724_v41, %s2506_s6 }
  0xc4   : > { %809 = vrot.lane.b32.xlu0 %v2757_v55, %s2506_s6 }
  0xc5   : > { %v3260_v31 = vpop.permute.xlu1 %544 }
  0xc6   : > { %4644 = vst [vmem:[#allocation59_spill] sm:$0xff] %v3260_v31  ;;  %v3262_v26 = vpop.permute.xlu0 %550 }
  0xc7   : > { %807 = vrot.lane.b32.xlu1 %v2740_v48, %s2506_s6 }
  0xc8   : > { %813 = vrot.lane.b32.xlu0 %v2775_v0, %s2506_s6 }
  0xc9   : > { %v3268_v17 = vpop.permute.xlu1 %548 }
  0xca   : > { %4645 = vst [vmem:[#allocation60_spill] sm:$0xff] %v3268_v17  ;;  %v3270_v61 = vpop.permute.xlu0 %554 }
  0xcb   : > { %811 = vrot.lane.b32.xlu1 %v2759_v56, %s2506_s6 }
  0xcc   : > { %817 = vrot.lane.b32.xlu0 %v2813_v19, %s2506_s6 }
  0xcd   : > { %v3276_v29 = vpop.permute.xlu1 %552 }
  0xce   : > { %v3278_v31 = vpop.permute.xlu0 %558 }
  0xcf   : > { %4646 = vst [vmem:[#allocation61_spill] sm:$0xff] %v3278_v31  ;;  %815 = vrot.lane.b32.xlu1 %v2777_v1, %s2506_s6  ;;  %v4684_v31 = vld [vmem:[#allocation15_spill] sm:$0xff] }
  0xd0   : > { %821 = vrot.lane.b32.xlu0 %v2832_v27, %s2506_s6 }
  0xd1   : > { %v3284_v0 = vpop.permute.xlu1 %556 }
  0xd2   : > { %4647 = vst [vmem:[#allocation62_spill] sm:$0xff] %v3284_v0  ;;  %v3286_v17 = vpop.permute.xlu0 %562 }
  0xd3   : > { %4648 = vst [vmem:[#allocation63_spill] sm:$0xff] %v3286_v17  ;;  %819 = vrot.lane.b32.xlu1 %v2815_v20, %s2506_s6 }
  0xd4   : > { %825 = vrot.lane.b32.xlu0 %v2851_v44, %s2506_s6 }
  0xd5   : > { %v3292_v56 = vpop.permute.xlu1 %560 }
  0xd6   : > { %4649 = vst [vmem:[#allocation64_spill] sm:$0xff] %v3292_v56  ;;  %v3294_v19 = vpop.permute.xlu0 %566 }
  0xd7   : > { %4650 = vst [vmem:[#allocation65_spill] sm:$0xff] %v3294_v19  ;;  %823 = vrot.lane.b32.xlu1 %v2834_v28, %s2506_s6 }
  0xd8   : > { %829 = vrot.lane.b32.xlu0 %v2870_v63, %s2506_s6 }
  0xd9   : > { %v3300_v1 = vpop.permute.xlu1 %564 }
  0xda   : > { %4651 = vst [vmem:[#allocation66_spill] sm:$0xff] %v3300_v1  ;;  %v3302_v30 = vpop.permute.xlu0 %570 }
  0xdb   : > { %4652 = vst [vmem:[#allocation67_spill] sm:$0xff] %v3302_v30  ;;  %827 = vrot.lane.b32.xlu1 %v2853_v45, %s2506_s6 }
  0xdc   : > { %833 = vrot.lane.b32.xlu0 %v2889_v14, %s2506_s6 }
  0xdd   : > { %v3308_v20 = vpop.permute.xlu1 %568 }
  0xde   : > { %4653 = vst [vmem:[#allocation68_spill] sm:$0xff] %v3308_v20  ;;  %v3310_v44 = vpop.permute.xlu0 %574 }
  0xdf   : > { %4654 = vst [vmem:[#allocation69_spill] sm:$0xff] %v3310_v44  ;;  %831 = vrot.lane.b32.xlu1 %v2872_v2, %s2506_s6 }
  0xe0   : > { %837 = vrot.lane.b32.xlu0 %v2908_v38, %s2506_s6 }
  0xe1   : > { %v3316_v28 = vpop.permute.xlu1 %572 }
  0xe2   : > { %4655 = vst [vmem:[#allocation70_spill] sm:$0xff] %v3316_v28  ;;  %v3318_v19 = vpop.permute.xlu0 %578 }
  0xe3   : > { %4656 = vst [vmem:[#allocation71_spill] sm:$0xff] %v3318_v19  ;;  %835 = vrot.lane.b32.xlu1 %v2891_v15, %s2506_s6 }
  0xe4   : > { %841 = vrot.lane.b32.xlu0 %v2927_v3, %s2506_s6 }
  0xe5   : > { %v3324_v45 = vpop.permute.xlu1 %576 }
  0xe6   : > { %4657 = vst [vmem:[#allocation72_spill] sm:$0xff] %v3324_v45  ;;  %v3326_v30 = vpop.permute.xlu0 %695  ;;  %v3342_v45 = vld [vmem:[#allocation2 + $0x180] sm:$0xff] }
  0xe7   : > { %839 = vrot.lane.b32.xlu1 %v2910_v39, %s2506_s6  ;;  %4659 = vst [vmem:[#allocation74_spill] sm:$0xff] %v3342_v45 }
  0xe8   : > { %845 = vrot.lane.b32.xlu0 %v2946_v12, %s2506_s6 }
  0xe9   : > { %v3332_v44 = vpop.permute.xlu1 %580 }
  0xea   : > { %4658 = vst [vmem:[#allocation73_spill] sm:$0xff] %v3332_v44  ;;  %v3334_v28 = vpop.permute.xlu0 %699 }
  0xeb   : > { %843 = vrot.lane.b32.xlu1 %v2929_v62, %s2506_s6 }
  0xec   : > { %849 = vrot.lane.b32.xlu0 %v2965_v21, %s2506_s6  ;;  %v3356_v21 = vld [vmem:[#allocation2 + $0x188] sm:$0xff] }
  0xed   : > { %v3340_v19 = vpop.permute.xlu1 %697  ;;  %4663 = vst [vmem:[#allocation78_spill] sm:$0xff] %v3356_v21 }
  0xee   : > { %v3344_v20 = vpop.permute.xlu0 %703 }
  0xef   : > { %4660 = vst [vmem:[#allocation75_spill] sm:$0xff] %v3344_v20  ;;  %847 = vrot.lane.b32.xlu1 %v2948_v60, %s2506_s6 }
  0xf0   : > { %853 = vrot.lane.b32.xlu0 %v3342_v45, %s2506_s6 }
  0xf1   : > { %v3350_v44 = vpop.permute.xlu1 %701 }
  0xf2   : > { %4661 = vst [vmem:[#allocation76_spill] sm:$0xff] %v3350_v44  ;;  %v3352_v1 = vpop.permute.xlu0 %707  ;;  %v4687_v44 = vld [vmem:[#allocation17_spill] sm:$0xff] }
  0xf3   : > { %4662 = vst [vmem:[#allocation77_spill] sm:$0xff] %v3352_v1  ;;  %851 = vrot.lane.b32.xlu1 %v2967_v25, %s2506_s6  ;;  %v4668_v25 = vld [vmem:[#allocation6_spill] sm:$0xff] }
  0xf4   : > { %895 = vrot.lane.b32.xlu0 %v2729_v43, %s2507_s7 }
  0xf5   : > { %v3360_v58 = vpop.permute.xlu1 %705 }
  0xf6   : > { %4664 = vst [vmem:[#allocation79_spill] sm:$0xff] %v3360_v58  ;;  %v3362_v17 = vpop.permute.xlu0 %711 }
  0xf7   : > { %4665 = vst [vmem:[#allocation80_spill] sm:$0xff] %v3362_v17  ;;  %855 = vrot.lane.b32.xlu1 %v3356_v21, %s2506_s6  ;;  %v4671_v17 = vld [vmem:[#allocation7_spill] sm:$0xff]  ;;  %v4672_v21 = vld [vmem:[#allocation8_spill] sm:$0xff]  ;;  %s199_s6 = sand.u32 1, %s2485_s13  }
  0xf8   : > { %899 = vrot.lane.b32.xlu0 %v2736_v46, %s2507_s7  ;;  %s4456_s15 = scalar_lea.sflag [#allocation4], %s199_s6 }
  0xf9   : > { %v3368_v1 = vpop.permute.xlu1 %709 }
  0xfa   : > { %4666 = vst [vmem:[#allocation81_spill] sm:$0xff] %v3368_v1  ;;  %v3370_v45 = vpop.permute.xlu0 %715 }
  0xfb   : > { %4667 = vst [vmem:[#allocation82_spill] sm:$0xff] %v3370_v45  ;;  %897 = vrot.lane.b32.xlu1 %v2743_v49, %s2507_s7  ;;  %v4675_v45 = vld [vmem:[#allocation9_spill] sm:$0xff]  ;;  %v4676_v49 = vld [vmem:[#allocation10_spill] sm:$0xff] }
  0xfc   : > { %903 = vrot.lane.b32.xlu0 %v4668_v25, %s2507_s7 }
  0xfd   : > { %v3376_v43 = vpop.permute.xlu1 %713 }
  0xfe   : > { %4669 = vst [vmem:[#allocation6_spill] sm:$0xff] %v3376_v43  ;;  %v3378_v11 = vpop.permute.xlu0 %719 }
  0xff   : > { %4670 = vst [vmem:[#allocation83_spill] sm:$0xff] %v3378_v11  ;;  %901 = vrot.lane.b32.xlu1 %v4671_v17, %s2507_s7  ;;  %v4678_v11 = vld [vmem:[#allocation11_spill] sm:$0xff] }
 0x100   : > { %907 = vrot.lane.b32.xlu0 %v4672_v21, %s2507_s7 }
 0x101   : > { %v3384_v56 = vpop.permute.xlu1 %717 }
 0x102   : > { %4673 = vst [vmem:[#allocation7_spill] sm:$0xff] %v3384_v56  ;;  %v3386_v1 = vpop.permute.xlu0 %723 }
 0x103   : > { %4674 = vst [vmem:[#allocation8_spill] sm:$0xff] %v3386_v1  ;;  %905 = vrot.lane.b32.xlu1 %v4675_v45, %s2507_s7  ;;  %v4681_v1 = vld [vmem:[#allocation13_spill] sm:$0xff] }
 0x104   : > { %911 = vrot.lane.b32.xlu0 %v4676_v49, %s2507_s7 }
 0x105   : > { %v3392_v58 = vpop.permute.xlu1 %721 }
 0x106   : > { %4677 = vst [vmem:[#allocation9_spill] sm:$0xff] %v3392_v58  ;;  %v3394_v43 = vpop.permute.xlu0 %727 }
 0x107   : > { %909 = vrot.lane.b32.xlu1 %v4678_v11, %s2507_s7 }
 0x108   : > { %915 = vrot.lane.b32.xlu0 %v4679_v57, %s2507_s7 }
 0x109   : > { %v3400_v20 = vpop.permute.xlu1 %725 }
 0x10a   : > { %4680 = vst [vmem:[#allocation10_spill] sm:$0xff] %v3400_v20  ;;  %v3402_v56 = vpop.permute.xlu0 %731 }
 0x10b   : > { %913 = vrot.lane.b32.xlu1 %v4681_v1, %s2507_s7 }
 0x10c   : > { %919 = vrot.lane.b32.xlu0 %v4682_v51, %s2507_s7 }
 0x10d   : > { %v3408_v24 = vpop.permute.xlu1 %729 }
 0x10e   : > { %v3410_v58 = vpop.permute.xlu0 %735 }
 0x10f   : > { %4683 = vst [vmem:[#allocation11_spill] sm:$0xff] %v3410_v58  ;;  %917 = vrot.lane.b32.xlu1 %v4684_v31, %s2507_s7 }
 0x110   : > { %927 = vrot.lane.b32.xlu0 %v4685_v10, %s2507_s7 }
 0x111   : > { %v3416_v0 = vpop.permute.xlu1 %733 }
 0x112   : > { %v3418_v20 = vpop.permute.xlu0 %739 }
 0x113   : > { %4686 = vst [vmem:[#allocation12_spill] sm:$0xff] %v3418_v20  ;;  %921 = vrot.lane.b32.xlu1 %v4687_v44, %s2507_s7 }
 0x114   : > { %996 = vrot.lane.b32.xlu0 %v3020_v18, %s2508_s8 }
 0x115   : > { %v3424_v51 = vpop.permute.xlu1 %737 }
 0x116   : > { %v3426_v58 = vpop.permute.xlu0 %743 }
 0x117   : > { %4688 = vst [vmem:[#allocation13_spill] sm:$0xff] %v3426_v58  ;;  %929 = vrot.lane.b32.xlu1 %v4689_v50, %s2507_s7  ;;  %v2394_v50 = vld [vmem:[#allocation2] sm:$0xff] }
 0x118   : > { %998 = vrot.lane.b32.xlu0 %v3037_v7, %s2508_s8 }
 0x119   : > { %v3432_v10 = vpop.permute.xlu1 %741 }
 0x11a   : > { %4690 = vst [vmem:[#allocation15_spill] sm:$0xff] %v3432_v10  ;;  %v3434_v20 = vpop.permute.xlu0 %747 }
 0x11b   : > { %4691 = vst [vmem:[#allocation17_spill] sm:$0xff] %v3434_v20  ;;  %1028 = vrot.lane.b32.xlu1 %v3121_v34, %s2508_s8  ;;  %v1660_v20 = vld [vmem:[%s4503_s1 + $0x20] sm:$0xf] }
 0x11c   : > { %1094 = vrot.lane.b32.xlu0 %v2707_v32, %s2509_s9  ;;  %2260 = vmatprep.subr.msk.mxu0 %vm1765_vm4, %v1660_v20  ;;  %v1659_v32 = vld [vmem:[%s4503_s1 + $0x18] sm:$0xff] }
 0x11d   : > { %v3440_v18 = vpop.permute.xlu1 %745  ;;  %2261 = vmatpush3.msk.msra.mxu0 %vm1765_vm4, %v1660_v20  ;;  %2318 = vmatprep.subr.msk.mxu1 %vm1765_vm4, %v1660_v20 }
 0x11e   : > { %4692 = vst [vmem:[#allocation84_spill] sm:$0xff] %v3440_v18  ;;  %v3442_v58 = vpop.permute.xlu0 %751  ;;  %2262 = vmatprep.subr.mxu0 %v1659_v32  ;;  %2323 = vmatpush3.msk.msra.mxu1 %vm1765_vm4, %v1660_v20  ;;  %v1656_v20 = vld [vmem:[%s4503_s1] sm:$0xff] }
 0x11f   : > { %4693 = vst [vmem:[#allocation85_spill] sm:$0xff] %v3442_v58  ;;  %1030 = vrot.lane.b32.xlu1 %v3141_v23, %s2508_s8  ;;  %2263 = vmatpush3.msra.mxu0 %v1659_v32 }
 0x120   : > { %1096 = vrot.lane.b32.xlu0 %v2714_v35, %s2509_s9  ;;  %2319 = vmatprep.subr.mxu1 %v1659_v32 }
 0x121   : > { %v3448_v7 = vpop.permute.xlu1 %749  ;;  %2324 = vmatpush3.msra.mxu1 %v1659_v32 }
 0x122   : > { %4694 = vst [vmem:[#allocation86_spill] sm:$0xff] %v3448_v7  ;;  %v3453_v34 = vpop.permute.xlu0 %755  ;;  %v4699_v7 = vld [vmem:[#allocation23_spill] sm:$0xff] }
 0x123   : > { %4695 = vst [vmem:[#allocation87_spill] sm:$0xff] %v3453_v34  ;;  %1126 = vrot.lane.b32.xlu1 %v2870_v63, %s2509_s9  ;;  %v1658_v34 = vld [vmem:[%s4503_s1 + $0x10] sm:$0xff] }
 0x124   : > { %1196 = vrot.lane.b32.xlu0 %v2736_v46, %s2510_s21  ;;  %2264 = vmatprep.subr.mxu0 %v1658_v34  ;;  %v1657_v46 = vld [vmem:[%s4503_s1 + $0x8] sm:$0xff] }
 0x125   : > { %v3462_v35 = vpop.permute.xlu1 %753  ;;  %2265 = vmatpush3.msra.mxu0 %v1658_v34  ;;  %2320 = vmatprep.subr.mxu1 %v1658_v34 }
 0x126   : > { %4696 = vst [vmem:[#allocation88_spill] sm:$0xff] %v3462_v35  ;;  %v3467_v63 = vpop.permute.xlu0 %793  ;;  %v4697_v35 = vld [vmem:[#allocation20_spill] sm:$0xff]  ;;  %2266 = vmatprep.subr.mxu0 %v1657_v46  ;;  %2325 = vmatpush3.msra.mxu1 %v1658_v34 }
 0x127   : > { %1128 = vrot.lane.b32.xlu1 %v2872_v2, %s2509_s9  ;;  %2267 = vmatpush3.msra.mxu0 %v1657_v46 }
 0x128   : > { %931 = vrot.lane.b32.xlu0 %v4697_v35, %s2507_s7  ;;  %2268 = vmatprep.subr.mxu0 %v1656_v20 }
 0x129   : > { %v3476_v58 = vpop.permute.xlu1 %757  ;;  %2269 = vmatpush3.msra.mxu0 %v1656_v20  ;;  %2321 = vmatprep.subr.mxu1 %v1657_v46 }
 0x12a   : > { %4698 = vst [vmem:[#allocation20_spill] sm:$0xff] %v3476_v58  ;;  %v3481_v2 = vpop.permute.xlu0 %797  ;;  %2326 = vmatpush3.msra.mxu1 %v1657_v46 }
 0x12b   : > { %1228 = vrot.lane.b32.xlu1 %v4697_v35, %s2510_s21  ;;  %2322 = vmatprep.subr.mxu1 %v1656_v20 }
 0x12c   : > { %1230 = vrot.lane.b32.xlu0 %v4699_v7, %s2510_s21  ;;  %2327 = vmatpush3.msra.mxu1 %v1656_v20 }
 0x12d   : > { %v3487_v18 = vpop.permute.xlu1 %795 }
 0x12e   : > { %v3489_v58 = vpop.permute.xlu0 %801 }
 0x12f   : > { %1198 = vrot.lane.b32.xlu1 %v4671_v17, %s2510_s21 }
 0x130   : > { %1329 = vrot.lane.b32.xlu0 %v3134_v54, %s2511_s4 }
 0x131   : > { %v3495_v32 = vpop.permute.xlu1 %799 }
 0x132   : > { %v3497_v35 = vpop.permute.xlu0 %805 }
 0x133   : > { %1297 = vrot.lane.b32.xlu1 %v3031_v9, %s2511_s4 }
 0x134   : > { %1000 = vrot.lane.b32.xlu0 %v3031_v9, %s2508_s8 }
 0x135   : > { %v3503_v34 = vpop.permute.xlu1 %803 }
 0x136   : > { %v3505_v17 = vpop.permute.xlu0 %809 }
 0x137   : > { %4700 = vst [vmem:[#allocation23_spill] sm:$0xff] %v3505_v17  ;;  %933 = vrot.lane.b32.xlu1 %v4699_v7, %s2507_s7 }
 0x138   : > { %1299 = vrot.lane.b32.xlu0 %v3050_v16, %s2511_s4 }
 0x139   : > { %v3511_v46 = vpop.permute.xlu1 %807 }
 0x13a   : > { %4701 = vst [vmem:[#allocation89_spill] sm:$0xff] %v3511_v46  ;;  %v3513_v20 = vpop.permute.xlu0 %813 }
 0x13b   : > { %4702 = vst [vmem:[#allocation90_spill] sm:$0xff] %v3513_v20  ;;  %1032 = vrot.lane.b32.xlu1 %v3134_v54, %s2508_s8 }
 0x13c   : > { %1002 = vrot.lane.b32.xlu0 %v3050_v16, %s2508_s8 }
 0x13d   : > { %v3519_v9 = vpop.permute.xlu1 %811 }
 0x13e   : > { %4703 = vst [vmem:[#allocation91_spill] sm:$0xff] %v3519_v9  ;;  %v3521_v23 = vpop.permute.xlu0 %817 }
 0x13f   : > { %4704 = vst [vmem:[#allocation92_spill] sm:$0xff] %v3521_v23  ;;  %1331 = vrot.lane.b32.xlu1 %v3154_v13, %s2511_s4 }
 0x140   : > { %1098 = vrot.lane.b32.xlu0 %v2722_v40, %s2509_s9 }
 0x141   : > { %v3527_v7 = vpop.permute.xlu1 %815 }
 0x142   : > { %4705 = vst [vmem:[#allocation93_spill] sm:$0xff] %v3527_v7  ;;  %v3529_v17 = vpop.permute.xlu0 %821 }
 0x143   : > { %4706 = vst [vmem:[#allocation94_spill] sm:$0xff] %v3529_v17  ;;  %1034 = vrot.lane.b32.xlu1 %v3154_v13, %s2508_s8  ;;  %v4709_v13 = vld [vmem:[#allocation22_spill] sm:$0xff] }
 0x144   : > { %1100 = vrot.lane.b32.xlu0 %v2724_v41, %s2509_s9 }
 0x145   : > { %v3535_v16 = vpop.permute.xlu1 %819 }
 0x146   : > { %4707 = vst [vmem:[#allocation95_spill] sm:$0xff] %v3535_v16  ;;  %v3537_v54 = vpop.permute.xlu0 %825 }
 0x147   : > { %1130 = vrot.lane.b32.xlu1 %v2889_v14, %s2509_s9  ;;  %v4710_v14 = vld [vmem:[#allocation25_spill] sm:$0xff] }
 0x148   : > { %1200 = vrot.lane.b32.xlu0 %v4668_v25, %s2510_s21 }
 0x149   : > { %v3543_v40 = vpop.permute.xlu1 %823 }
 0x14a   : > { %4708 = vst [vmem:[#allocation96_spill] sm:$0xff] %v3543_v40  ;;  %v3545_v23 = vpop.permute.xlu0 %829 }
 0x14b   : > { %1132 = vrot.lane.b32.xlu1 %v2891_v15, %s2509_s9 }
 0x14c   : > { %935 = vrot.lane.b32.xlu0 %v4709_v13, %s2507_s7 }
 0x14d   : > { %v3551_v41 = vpop.permute.xlu1 %827 }
 0x14e   : > { %v3553_v17 = vpop.permute.xlu0 %833 }
 0x14f   : > { %1232 = vrot.lane.b32.xlu1 %v4709_v13, %s2510_s21 }
 0x150   : > { %1234 = vrot.lane.b32.xlu0 %v4710_v14, %s2510_s21 }
 0x151   : > { %v3559_v25 = vpop.permute.xlu1 %831 }
 0x152   : > { %v3561_v40 = vpop.permute.xlu0 %837 }
 0x153   : > { %1202 = vrot.lane.b32.xlu1 %v4675_v45, %s2510_s21 }
 0x154   : > { %1333 = vrot.lane.b32.xlu0 %v3147_v6, %s2511_s4 }
 0x155   : > { %v3567_v15 = vpop.permute.xlu1 %835 }
 0x156   : > { %v3569_v16 = vpop.permute.xlu0 %841 }
 0x157   : > { %4711 = vst [vmem:[#allocation22_spill] sm:$0xff] %v3569_v16  ;;  %1301 = vrot.lane.b32.xlu1 %v3043_v37, %s2511_s4 }
 0x158   : > { %1004 = vrot.lane.b32.xlu0 %v3043_v37, %s2508_s8 }
 0x159   : > { %v3575_v13 = vpop.permute.xlu1 %839 }
 0x15a   : > { %4712 = vst [vmem:[#allocation25_spill] sm:$0xff] %v3575_v13  ;;  %v3577_v7 = vpop.permute.xlu0 %845  ;;  %v4732_v13 = vld [vmem:[#allocation43_spill] sm:$0xff] }
 0x15b   : > { %4713 = vst [vmem:[#allocation97_spill] sm:$0xff] %v3577_v7  ;;  %937 = vrot.lane.b32.xlu1 %v4710_v14, %s2507_s7  ;;  %v1393_v10 = vsel %vm214_vm0, %v2394_v50, %v4732_v13 }
 0x15c   : > { %1303 = vrot.lane.b32.xlu0 %v3063_v53, %s2511_s4 }
 0x15d   : > { %v3583_v45 = vpop.permute.xlu1 %843 }
 0x15e   : > { %4714 = vst [vmem:[#allocation98_spill] sm:$0xff] %v3583_v45  ;;  %v3585_v20 = vpop.permute.xlu0 %849 }
 0x15f   : > { %4715 = vst [vmem:[#allocation99_spill] sm:$0xff] %v3585_v20  ;;  %1036 = vrot.lane.b32.xlu1 %v3147_v6, %s2508_s8 }
 0x160   : > { %1006 = vrot.lane.b32.xlu0 %v3063_v53, %s2508_s8 }
 0x161   : > { %v3591_v37 = vpop.permute.xlu1 %847 }
 0x162   : > { %4716 = vst [vmem:[#allocation100_spill] sm:$0xff] %v3591_v37  ;;  %v3593_v9 = vpop.permute.xlu0 %853 }
 0x163   : > { %4717 = vst [vmem:[#allocation101_spill] sm:$0xff] %v3593_v9  ;;  %1335 = vrot.lane.b32.xlu1 %v3167_v59, %s2511_s4 }
 0x164   : > { %1102 = vrot.lane.b32.xlu0 %v2738_v47, %s2509_s9 }
 0x165   : > { %v3599_v14 = vpop.permute.xlu1 %851 }
 0x166   : > { %4718 = vst [vmem:[#allocation102_spill] sm:$0xff] %v3599_v14  ;;  %v3601_v7 = vpop.permute.xlu0 %895 }
 0x167   : > { %1038 = vrot.lane.b32.xlu1 %v3167_v59, %s2508_s8  ;;  %v4720_v59 = vld [vmem:[#allocation24_spill] sm:$0xff] }
 0x168   : > { %1104 = vrot.lane.b32.xlu0 %v2740_v48, %s2509_s9 }
 0x169   : > { %v3607_v53 = vpop.permute.xlu1 %855 }
 0x16a   : > { %4719 = vst [vmem:[#allocation103_spill] sm:$0xff] %v3607_v53  ;;  %v3609_v6 = vpop.permute.xlu0 %899 }
 0x16b   : > { %1134 = vrot.lane.b32.xlu1 %v2908_v38, %s2509_s9 }
 0x16c   : > { %1204 = vrot.lane.b32.xlu0 %v4672_v21, %s2510_s21 }
 0x16d   : > { %v3615_v47 = vpop.permute.xlu1 %897 }
 0x16e   : > { %v3617_v9 = vpop.permute.xlu0 %903 }
 0x16f   : > { %1136 = vrot.lane.b32.xlu1 %v2910_v39, %s2509_s9 }
 0x170   : > { %939 = vrot.lane.b32.xlu0 %v4720_v59, %s2507_s7 }
 0x171   : > { %v3623_v48 = vpop.permute.xlu1 %901 }
 0x172   : > { %v3625_v53 = vpop.permute.xlu0 %907 }
 0x173   : > { %1236 = vrot.lane.b32.xlu1 %v4720_v59, %s2510_s21 }
 0x174   : > { %1238 = vrot.lane.b32.xlu0 %v2970_v33, %s2510_s21 }
 0x175   : > { %v3631_v38 = vpop.permute.xlu1 %905 }
 0x176   : > { %v3633_v21 = vpop.permute.xlu0 %911 }
 0x177   : > { %4721 = vst [vmem:[#allocation24_spill] sm:$0xff] %v3633_v21  ;;  %1206 = vrot.lane.b32.xlu1 %v4678_v11, %s2510_s21  ;;  %v4726_v11 = vld [vmem:[#allocation33_spill] sm:$0xff] }
 0x178   : > { %1337 = vrot.lane.b32.xlu0 %v3160_v22, %s2511_s4 }
 0x179   : > { %v3639_v39 = vpop.permute.xlu1 %909 }
 0x17a   : > { %4722 = vst [vmem:[#allocation104_spill] sm:$0xff] %v3639_v39  ;;  %v3641_v14 = vpop.permute.xlu0 %915 }
 0x17b   : > { %4723 = vst [vmem:[#allocation105_spill] sm:$0xff] %v3641_v14  ;;  %1305 = vrot.lane.b32.xlu1 %v3056_v42, %s2511_s4 }
 0x17c   : > { %1008 = vrot.lane.b32.xlu0 %v3056_v42, %s2508_s8 }
 0x17d   : > { %v3647_v59 = vpop.permute.xlu1 %913 }
 0x17e   : > { %4724 = vst [vmem:[#allocation106_spill] sm:$0xff] %v3647_v59  ;;  %v3649_v20 = vpop.permute.xlu0 %919 }
 0x17f   : > { %4725 = vst [vmem:[#allocation107_spill] sm:$0xff] %v3649_v20  ;;  %941 = vrot.lane.b32.xlu1 %v2970_v33, %s2507_s7 }
 0x180   : > { %1307 = vrot.lane.b32.xlu0 %v4726_v11, %s2511_s4 }
 0x181   : > { %v3655_v37 = vpop.permute.xlu1 %917 }
 0x182   : > { %4727 = vst [vmem:[#allocation33_spill] sm:$0xff] %v3655_v37  ;;  %v928_v45 = vpop.permute.xlu0 %927 }
 0x183   : > { %1040 = vrot.lane.b32.xlu1 %v3160_v22, %s2508_s8  ;;  %v3673_v22 = vld [vmem:[#allocation2 + $0x80] sm:$0xff] }
 0x184   : > { %1010 = vrot.lane.b32.xlu0 %v4726_v11, %s2508_s8  ;;  %4729 = vst [vmem:[#allocation109_spill] sm:$0xff] %v3673_v22 }
 0x185   : > { %v3661_v42 = vpop.permute.xlu1 %921 }
 0x186   : > { %4728 = vst [vmem:[#allocation108_spill] sm:$0xff] %v3661_v42  ;;  %v997_v14 = vpop.permute.xlu0 %996 }
 0x187   : > { %1339 = vrot.lane.b32.xlu1 %v3182_v5, %s2511_s4 }
 0x188   : > { %1106 = vrot.lane.b32.xlu0 %v2757_v55, %s2509_s9 }
 0x189   : > { %v3667_v33 = vpop.permute.xlu1 %929 }
 0x18a   : > { %v3669_v20 = vpop.permute.xlu0 %998 }
 0x18b   : > { %1042 = vrot.lane.b32.xlu1 %v3182_v5, %s2508_s8  ;;  %v4730_v5 = vld [vmem:[#allocation26_spill] sm:$0xff] }
 0x18c   : > { %1108 = vrot.lane.b32.xlu0 %v3673_v22, %s2509_s9  ;;  %v4731_v22 = vld [vmem:[#allocation28_spill] sm:$0xff] }
 0x18d   : > { %v1029_v11 = vpop.permute.xlu1 %1028 }
 0x18e   : > { %v1095_v42 = vpop.permute.xlu0 %1094 }
 0x18f   : > { %1138 = vrot.lane.b32.xlu1 %v2927_v3, %s2509_s9 }
 0x190   : > { %1208 = vrot.lane.b32.xlu0 %v4676_v49, %s2510_s21 }
 0x191   : > { %v3681_v55 = vpop.permute.xlu1 %1030 }
 0x192   : > { %v1097_v37 = vpop.permute.xlu0 %1096 }
 0x193   : > { %1140 = vrot.lane.b32.xlu1 %v2929_v62, %s2509_s9  ;;  %v1409_v62 = vsel %vm214_vm0, %v2832_v27, %v3262_v26  ;;  %v4733_v27 = vld [vmem:[#allocation32_spill] sm:$0xff]  ;;  %v1426_v26 = vsel %vm1425_vm5, %v1393_v10, %v3326_v30 }
 0x194   : > { %943 = vrot.lane.b32.xlu0 %v4730_v5, %s2507_s7 }
 0x195   : > { %v1127_v59 = vpop.permute.xlu1 %1126 }
 0x196   : > { %v1197_v21 = vpop.permute.xlu0 %1196 }
 0x197   : > { %1240 = vrot.lane.b32.xlu1 %v4730_v5, %s2510_s21  ;;  %v1442_v5 = vsel %vm1425_vm5, %v1409_v62, %v3394_v43  ;;  %v1459_v43 = vsel %vm1458_vm6, %v1426_v26, %v3467_v63 }
 0x198   : > { %1242 = vrot.lane.b32.xlu0 %v4731_v22, %s2510_s21 }
 0x199   : > { %v3691_v3 = vpop.permute.xlu1 %1128 }
 0x19a   : > { %v3693_v49 = vpop.permute.xlu0 %931 }
 0x19b   : > { %1210 = vrot.lane.b32.xlu1 %v4681_v1, %s2510_s21  ;;  %v1475_v1 = vsel %vm1458_vm6, %v1442_v5, %v3537_v54  ;;  %v1492_v54 = vsel %vm1491_vm7, %v1459_v43, %v3601_v7  ;;  %v4734_v5 = vld [vmem:[#allocation44_spill] sm:$0xff]  ;;  %v3752_v43 = vld [vmem:[#allocation2 + $0xc8] sm:$0xff] }
 0x19c   : > { %1341 = vrot.lane.b32.xlu0 %v3173_v4, %s2511_s4  ;;  %v1508_v46 = vsel %vm1491_vm7, %v1475_v1, %v928_v45  ;;  %v1525_v10 = vsel %vm1524_vm8, %v1492_v54, %v997_v14  ;;  %v4735_v1 = vld [vmem:[#allocation35_spill] sm:$0xff] }
 0x19d   : > { %v1229_v16 = vpop.permute.xlu1 %1228  ;;  %v1541_v62 = vsel %vm1524_vm8, %v1508_v46, %v1029_v11  ;;  %v1558_v46 = vsel %vm1557_vm9, %v1525_v10, %v1095_v42  ;;  %v2395_v11 = vld [vmem:[#allocation2 + $0x8] sm:$0xff] }
 0x19e   : > { %v1231_v39 = vpop.permute.xlu0 %1230  ;;  %v1574_v13 = vsel %vm1557_vm9, %v1541_v62, %v1127_v59  ;;  %v1394_v7 = vsel %vm214_vm0, %v2395_v11, %v4734_v5  ;;  %v1591_v59 = vsel %vm1590_vm11, %v1558_v46, %v1197_v21 }
 0x19f   : > { %1309 = vrot.lane.b32.xlu1 %v4733_v27, %s2511_s4  ;;  %v1607_v30 = vsel %vm1590_vm11, %v1574_v13, %v1229_v16  ;;  %v1427_v14 = vsel %vm1425_vm5, %v1394_v7, %v3340_v19  ;;  %v3765_v13 = vld [vmem:[#allocation2 + $0x90] sm:$0xff] }
 0x1a0   : > { %1012 = vrot.lane.b32.xlu0 %v4733_v27, %s2508_s8  ;;  %v1460_v42 = vsel %vm1458_vm6, %v1427_v14, %v3487_v18 }
 0x1a1   : > { %v1199_v50 = vpop.permute.xlu1 %1198  ;;  %v1493_v21 = vsel %vm1491_vm7, %v1460_v42, %v3615_v47  ;;  %v4738_v42 = vld [vmem:[#allocation34_spill] sm:$0xff] }
 0x1a2   : > { %v1330_v63 = vpop.permute.xlu0 %1329  ;;  %v1526_v26 = vsel %vm1524_vm8, %v1493_v21, %v3669_v20 }
 0x1a3   : > { %945 = vrot.lane.b32.xlu1 %v4731_v22, %s2507_s7  ;;  %v1640_v45 = vsel %vm1623_vm10, %v1607_v30, %v1330_v63  ;;  %v1559_v18 = vsel %vm1557_vm9, %v1526_v26, %v1097_v37  ;;  %v3779_v63 = vld [vmem:[#allocation2 + $0x98] sm:$0xff] }
 0x1a4   : > { %1311 = vrot.lane.b32.xlu0 %v4735_v1, %s2511_s4  ;;  %2294 = vmatprep.mubr.msk.f32.mxu1 %vm1668_vm12, %v1640_v45  ;;  %v1592_v62 = vsel %vm1590_vm11, %v1559_v18, %v1199_v50 }
 0x1a5   : > { %v1298_v16 = vpop.permute.xlu1 %1297 }
 0x1a6   : > { %v1624_v22 = vsel %vm1623_vm10, %v1591_v59, %v1298_v16  ;;  %v3738_v27 = vpop.permute.xlu0 %1000  ;;  %v2400_v16 = vld [vmem:[#allocation2 + $0x18] sm:$0xff] }
 0x1a7   : > { %1044 = vrot.lane.b32.xlu1 %v3173_v4, %s2508_s8  ;;  %2270 = vmatprep.mubr.msk.f32.mxu0 %vm1668_vm12, %v1624_v22  ;;  %v1410_v4 = vsel %vm214_vm0, %v3752_v43, %v3276_v29  ;;  %v1395_v14 = vsel %vm214_vm0, %v2400_v16, %v3202_v36 }
 0x1a8   : > { %1014 = vrot.lane.b32.xlu0 %v4735_v1, %s2508_s8  ;;  %v1443_v20 = vsel %vm1425_vm5, %v1410_v4, %v3408_v24 }
 0x1a9   : > { %v3749_v19 = vpop.permute.xlu1 %933  ;;  %v1476_v37 = vsel %vm1458_vm6, %v1443_v20, %v3551_v41  ;;  %v4739_v20 = vld [vmem:[#allocation48_spill] sm:$0xff] }
 0x1aa   : > { %v1300_v54 = vpop.permute.xlu0 %1299  ;;  %v1509_v50 = vsel %vm1491_vm7, %v1476_v37, %v3667_v33  ;;  %v4740_v37 = vld [vmem:[#allocation37_spill] sm:$0xff] }
 0x1ab   : > { %1343 = vrot.lane.b32.xlu1 %v3197_v52, %s2511_s4  ;;  %v1625_v47 = vsel %vm1623_vm10, %v1592_v62, %v1300_v54  ;;  %v1542_v10 = vsel %vm1524_vm8, %v1509_v50, %v3681_v55  ;;  %v4736_v55 = vld [vmem:[#allocation27_spill] sm:$0xff]  ;;  %v2401_v54 = vld [vmem:[#allocation2 + $0x20] sm:$0xff] }
 0x1ac   : > { %1110 = vrot.lane.b32.xlu0 %v3765_v13, %s2509_s9  ;;  %2271 = vmatmul.mubr.msk.f32.vlgmr.msra.gmra.mxu0 %vm1668_vm12, %v1625_v47  ;;  %v1575_v41 = vsel %vm1557_vm9, %v1542_v10, %v3691_v3  ;;  %v1396_v47 = vsel %vm214_vm0, %v2401_v54, %v4739_v20  ;;  %v4748_v20 = vld [vmem:[#allocation45_spill] sm:$0xff] }
 0x1ad   : > { %v1033_v29 = vpop.permute.xlu1 %1032  ;;  %v1608_v30 = vsel %vm1590_vm11, %v1575_v41, %v1231_v39 }
 0x1ae   : > { %v1003_v24 = vpop.permute.xlu0 %1002 }
 0x1af   : > { %1046 = vrot.lane.b32.xlu1 %v3197_v52, %s2508_s8 }
 0x1b0   : > { %1112 = vrot.lane.b32.xlu0 %v3779_v63, %s2509_s9 }
 0x1b1   : > { %v1332_v46 = vpop.permute.xlu1 %1331 }
 0x1b2   : > { %v1641_v33 = vsel %vm1623_vm10, %v1608_v30, %v1332_v46  ;;  %v1099_v45 = vpop.permute.xlu0 %1098 }
 0x1b3   : > { %1142 = vrot.lane.b32.xlu1 %v2946_v12, %s2509_s9  ;;  %2295 = vmatmul.mubr.msk.f32.vlgmr.msra.gmra.mxu1 %vm1668_vm12, %v1641_v33  ;;  %v4737_v12 = vld [vmem:[#allocation30_spill] sm:$0xff] }
 0x1b4   : > { %1212 = vrot.lane.b32.xlu0 %v4679_v57, %s2510_s21  ;;  %v3803_v57 = vld [vmem:[#allocation2 + $0xd8] sm:$0xff] }
 0x1b5   : > { %v3789_v52 = vpop.permute.xlu1 %1034 }
 0x1b6   : > { %v1101_v39 = vpop.permute.xlu0 %1100 }
 0x1b7   : > { %1144 = vrot.lane.b32.xlu1 %v2948_v60, %s2509_s9  ;;  %v1411_v60 = vsel %vm214_vm0, %v3803_v57, %v3270_v61  ;;  %v1428_v61 = vsel %vm1425_vm5, %v1395_v14, %v3334_v28 }
 0x1b8   : > { %947 = vrot.lane.b32.xlu0 %v4736_v55, %s2507_s7  ;;  %v1444_v1 = vsel %vm1425_vm5, %v1411_v60, %v3402_v56  ;;  %v1461_v56 = vsel %vm1458_vm6, %v1428_v61, %v3481_v2 }
 0x1b9   : > { %v1131_v3 = vpop.permute.xlu1 %1130 }
 0x1ba   : > { %v1201_v11 = vpop.permute.xlu0 %1200 }
 0x1bb   : > { %1244 = vrot.lane.b32.xlu1 %v4736_v55, %s2510_s21 }
 0x1bc   : > { %1246 = vrot.lane.b32.xlu0 %v4737_v12, %s2510_s21 }
 0x1bd   : > { %v1133_v5 = vpop.permute.xlu1 %1132 }
 0x1be   : > { %v3799_v7 = vpop.permute.xlu0 %935 }
 0x1bf   : > { %1214 = vrot.lane.b32.xlu1 %v4684_v31, %s2510_s21  ;;  %v1477_v31 = vsel %vm1458_vm6, %v1444_v1, %v3545_v23  ;;  %v1494_v23 = vsel %vm1491_vm7, %v1461_v56, %v3609_v6  ;;  %v3894_v56 = vld [vmem:[#allocation2 + $0x168] sm:$0xff] }
 0x1c0   : > { %1345 = vrot.lane.b32.xlu0 %v3188_v8, %s2511_s4  ;;  %v1510_v21 = vsel %vm1491_vm7, %v1477_v31, %v3693_v49  ;;  %v1527_v28 = vsel %vm1524_vm8, %v1494_v23, %v3738_v27 }
 0x1c1   : > { %v1233_v59 = vpop.permute.xlu1 %1232  ;;  %v1543_v26 = vsel %vm1524_vm8, %v1510_v21, %v1033_v29  ;;  %v1560_v2 = vsel %vm1557_vm9, %v1527_v28, %v1099_v45  ;;  %v4741_v29 = vld [vmem:[#allocation76_spill] sm:$0xff]  ;;  %v4746_v28 = vld [vmem:[#allocation31_spill] sm:$0xff] }
 0x1c2   : > { %v1235_v22 = vpop.permute.xlu0 %1234  ;;  %v1576_v18 = vsel %vm1557_vm9, %v1543_v26, %v1131_v3  ;;  %v1593_v6 = vsel %vm1590_vm11, %v1560_v2, %v1201_v11  ;;  %v1429_v50 = vsel %vm1425_vm5, %v1396_v47, %v4741_v29  ;;  %v4742_v3 = vld [vmem:[#allocation62_spill] sm:$0xff] }
 0x1c3   : > { %1313 = vrot.lane.b32.xlu1 %v4738_v42, %s2511_s4  ;;  %v1609_v4 = vsel %vm1590_vm11, %v1576_v18, %v1233_v59  ;;  %v1462_v41 = vsel %vm1458_vm6, %v1429_v50, %v3495_v32  ;;  %v3861_v32 = vld [vmem:[#allocation2 + $0xe0] sm:$0xff]  ;;  %v3874_v59 = vld [vmem:[#allocation2 + $0xa8] sm:$0xff]  ;;  %v3903_v26 = vld [vmem:[#allocation2 + $0x170] sm:$0xff] }
 0x1c4   : > { %1016 = vrot.lane.b32.xlu0 %v4738_v42, %s2508_s8  ;;  %v1495_v46 = vsel %vm1491_vm7, %v1462_v41, %v3623_v48  ;;  %v4743_v48 = vld [vmem:[#allocation47_spill] sm:$0xff]  ;;  %v3889_v42 = vld [vmem:[#allocation2 + $0xb0] sm:$0xff] }
 0x1c5   : > { %v1203_v36 = vpop.permute.xlu1 %1202  ;;  %v1528_v33 = vsel %vm1524_vm8, %v1495_v46, %v1003_v24  ;;  %v2407_v2 = vld [vmem:[#allocation2 + $0xf0] sm:$0xff]  ;;  %v4752_v46 = vld [vmem:[#allocation75_spill] sm:$0xff] }
 0x1c6   : > { %v1334_v49 = vpop.permute.xlu0 %1333  ;;  %v1561_v55 = vsel %vm1557_vm9, %v1528_v33, %v1101_v39  ;;  %v4750_v29 = vld [vmem:[#allocation46_spill] sm:$0xff] }
 0x1c7   : > { %949 = vrot.lane.b32.xlu1 %v4737_v12, %s2507_s7  ;;  %v1642_v62 = vsel %vm1623_vm10, %v1609_v4, %v1334_v49  ;;  %v1594_v11 = vsel %vm1590_vm11, %v1561_v55, %v1203_v36  ;;  %v4745_v36 = vld [vmem:[#allocation29_spill] sm:$0xff] }
 0x1c8   : > { %1315 = vrot.lane.b32.xlu0 %v4740_v37, %s2511_s4  ;;  %2297 = vmatprep.mubr.msk.f32.mxu1 %vm1668_vm12, %v1642_v62  ;;  %v4747_v62 = vld [vmem:[#allocation61_spill] sm:$0xff] }
 0x1c9   : > { %v1302_v27 = vpop.permute.xlu1 %1301  ;;  %v1413_v54 = vsel %vm214_vm0, %v2407_v2, %v4747_v62 }
 0x1ca   : > { %v1626_v10 = vsel %vm1623_vm10, %v1593_v6, %v1302_v27  ;;  %v3848_v30 = vpop.permute.xlu0 %1004  ;;  %v4749_v6 = vld [vmem:[#allocation11_spill] sm:$0xff]  ;;  %v2408_v27 = vld [vmem:[#allocation2 + $0x30] sm:$0xff] }
 0x1cb   : > { %1048 = vrot.lane.b32.xlu1 %v3188_v8, %s2508_s8  ;;  %2273 = vmatprep.mubr.msk.f32.mxu0 %vm1668_vm12, %v1626_v10  ;;  %v1412_v8 = vsel %vm214_vm0, %v3861_v32, %v4742_v3  ;;  %v1397_v50 = vsel %vm214_vm0, %v2408_v27, %v4750_v29 }
 0x1cc   : > { %1018 = vrot.lane.b32.xlu0 %v4740_v37, %s2508_s8  ;;  %v1445_v24 = vsel %vm1425_vm5, %v1412_v8, %v3416_v0  ;;  %v1446_v37 = vsel %vm1425_vm5, %v1413_v54, %v4749_v6  ;;  %v1430_v33 = vsel %vm1425_vm5, %v1397_v50, %v4752_v46  ;;  %v2411_v6 = vld [vmem:[#allocation2 + $0xc0] sm:$0xff]  ;;  %v4759_v46 = vld [vmem:[#allocation78_spill] sm:$0xff] }
 0x1cd   : > { %v3858_v45 = vpop.permute.xlu1 %937  ;;  %v1478_v39 = vsel %vm1458_vm6, %v1445_v24, %v3559_v25  ;;  %v1479_v10 = vsel %vm1458_vm6, %v1446_v37, %v3553_v17  ;;  %v1463_v3 = vsel %vm1458_vm6, %v1430_v33, %v3489_v58  ;;  %v891_v33 = vrot.slane %v4759_v46, 1 }
 0x1ce   : > { %v1304_v12 = vpop.permute.xlu0 %1303  ;;  %v1511_v16 = vsel %vm1491_vm7, %v1478_v39, %v3749_v19  ;;  %v1512_v55 = vsel %vm1491_vm7, %v1479_v10, %v3799_v7  ;;  %v1496_v17 = vsel %vm1491_vm7, %v1463_v3, %v3617_v9  ;;  %v2409_v39 = vld [vmem:[#allocation2 + $0x38] sm:$0xff] }
 0x1cf   : > { %1347 = vrot.lane.b32.xlu1 %v4743_v48, %s2511_s4  ;;  %v1627_v60 = vsel %vm1623_vm10, %v1594_v11, %v1304_v12  ;;  %v1544_v14 = vsel %vm1524_vm8, %v1511_v16, %v3789_v52  ;;  %v4744_v52 = vld [vmem:[#allocation14_spill] sm:$0xff] }
 0x1d0   : > { %1114 = vrot.lane.b32.xlu0 %v3874_v59, %s2509_s9  ;;  %2274 = vmatmul.mubr.msk.f32.gmra.mxu0 %vm1668_vm12, %v1627_v60  ;;  %v1577_v25 = vsel %vm1557_vm9, %v1544_v14, %v1133_v5  ;;  %v4754_v14 = vld [vmem:[#allocation39_spill] sm:$0xff] }
 0x1d1   : > { %v1037_v1 = vpop.permute.xlu1 %1036  ;;  %v1610_v31 = vsel %vm1590_vm11, %v1577_v25, %v1235_v22  ;;  %v4755_v25 = vld [vmem:[#allocation79_spill] sm:$0xff] }
 0x1d2   : > { %v3883_v0 = vpop.permute.xlu0 %1006  ;;  %v1545_v8 = vsel %vm1524_vm8, %v1512_v55, %v1037_v1  ;;  %v4753_v1 = vld [vmem:[#allocation51_spill] sm:$0xff] }
 0x1d3   : > { %1050 = vrot.lane.b32.xlu1 %v4743_v48, %s2508_s8  ;;  %v1529_v48 = vsel %vm1524_vm8, %v1496_v17, %v3848_v30  ;;  %v1398_v16 = vsel %vm214_vm0, %v2409_v39, %v4753_v1  ;;  %v2412_v39 = vld [vmem:[#allocation2 + $0x108] sm:$0xff]  ;;  %v4762_v1 = vld [vmem:[#allocation63_spill] sm:$0xff] }
 0x1d4   : > { %1116 = vrot.lane.b32.xlu0 %v3889_v42, %s2509_s9 }
 0x1d5   : > { %v1336_v61 = vpop.permute.xlu1 %1335 }
 0x1d6   : > { %v1643_v19 = vsel %vm1623_vm10, %v1610_v31, %v1336_v61  ;;  %v1103_v21 = vpop.permute.xlu0 %1102  ;;  %v1431_v31 = vsel %vm1425_vm5, %v1398_v16, %v4755_v25  ;;  %v1415_v16 = vsel %vm214_vm0, %v2412_v39, %v4762_v1 }
 0x1d7   : > { %1146 = vrot.lane.b32.xlu1 %v3894_v56, %s2509_s9  ;;  %2298 = vmatmul.mubr.msk.f32.gmra.mxu1 %vm1668_vm12, %v1643_v19  ;;  %v1562_v58 = vsel %vm1557_vm9, %v1529_v48, %v1103_v21  ;;  %v1464_v19 = vsel %vm1458_vm6, %v1431_v31, %v3503_v34  ;;  %v2413_v31 = vld [vmem:[#allocation2 + $0x48] sm:$0xff] }
 0x1d8   : > { %1216 = vrot.lane.b32.xlu0 %v4744_v52, %s2510_s21  ;;  %v1497_v52 = vsel %vm1491_vm7, %v1464_v19, %v3631_v38 }
 0x1d9   : > { %v3901_v5 = vpop.permute.xlu1 %1038 }
 0x1da   : > { %v1105_v22 = vpop.permute.xlu0 %1104 }
 0x1db   : > { %1148 = vrot.lane.b32.xlu1 %v3903_v26, %s2509_s9 }
 0x1dc   : > { %951 = vrot.lane.b32.xlu0 %v4745_v36, %s2507_s7 }
 0x1dd   : > { %v1135_v23 = vpop.permute.xlu1 %1134 }
 0x1de   : > { %v1205_v18 = vpop.permute.xlu0 %1204  ;;  %v1578_v12 = vsel %vm1557_vm9, %v1545_v8, %v1135_v23  ;;  %v4012_v8 = vld [vmem:[#allocation2 + $0x190] sm:$0x3] }
 0x1df   : > { %1248 = vrot.lane.b32.xlu1 %v4745_v36, %s2510_s21  ;;  %v1595_v9 = vsel %vm1590_vm11, %v1562_v58, %v1205_v18  ;;  %v1530_v36 = vsel %vm1524_vm8, %v1497_v52, %v3883_v0  ;;  %v2410_v18 = vld [vmem:[#allocation2 + $0xf8] sm:$0xff]  ;;  %v893_v17 = vrot.slane %v4012_v8, 1  ;;  %v992_v58 = vrot.slane %v4759_v46, 2 }
 0x1e0   : > { %1250 = vrot.lane.b32.xlu0 %v4746_v28, %s2510_s21  ;;  %v1563_v34 = vsel %vm1557_vm9, %v1530_v36, %v1105_v22 }
 0x1e1   : > { %v1137_v4 = vpop.permute.xlu1 %1136 }
 0x1e2   : > { %v3913_v49 = vpop.permute.xlu0 %939 }
 0x1e3   : > { %1218 = vrot.lane.b32.xlu1 %v4687_v44, %s2510_s21  ;;  %v4751_v44 = vld [vmem:[#allocation36_spill] sm:$0xff] }
 0x1e4   : > { %1349 = vrot.lane.b32.xlu0 %v4748_v20, %s2511_s4 }
 0x1e5   : > { %v1237_v47 = vpop.permute.xlu1 %1236 }
 0x1e6   : > { %v1239_v41 = vpop.permute.xlu0 %1238  ;;  %v1611_v24 = vsel %vm1590_vm11, %v1578_v12, %v1237_v47  ;;  %v4761_v12 = vld [vmem:[#allocation19_spill] sm:$0xff] }
 0x1e7   : > { %1317 = vrot.lane.b32.xlu1 %v4751_v44, %s2511_s4 }
 0x1e8   : > { %1020 = vrot.lane.b32.xlu0 %v4751_v44, %s2508_s8 }
 0x1e9   : > { %v1207_v11 = vpop.permute.xlu1 %1206 }
 0x1ea   : > { %v1338_v7 = vpop.permute.xlu0 %1337  ;;  %v1596_v62 = vsel %vm1590_vm11, %v1563_v34, %v1207_v11  ;;  %v4766_v34 = vld [vmem:[#allocation77_spill] sm:$0xff] }
 0x1eb   : > { %953 = vrot.lane.b32.xlu1 %v4746_v28, %s2507_s7  ;;  %v1644_v60 = vsel %vm1623_vm10, %v1611_v24, %v1338_v7  ;;  %v4756_v28 = vld [vmem:[#allocation64_spill] sm:$0xff] }
 0x1ec   : > { %1319 = vrot.lane.b32.xlu0 %v4754_v14, %s2511_s4  ;;  %2300 = vmatprep.mubr.msk.f32.mxu1 %vm1668_vm12, %v1644_v60  ;;  %v1414_v2 = vsel %vm214_vm0, %v2410_v18, %v4756_v28  ;;  %v894_v60 = vsel %vm437_vm2, %v891_v33, %v893_v17  ;;  %v2415_v17 = vld [vmem:[#allocation2 + $0x110] sm:$0xff] }
 0x1ed   : > { %v1306_v30 = vpop.permute.xlu1 %1305  ;;  %v1447_v38 = vsel %vm1425_vm5, %v1414_v2, %v3424_v51 }
 0x1ee   : > { %v1628_v61 = vsel %vm1623_vm10, %v1595_v9, %v1306_v30  ;;  %v3959_v21 = vpop.permute.xlu0 %1008  ;;  %v1480_v47 = vsel %vm1458_vm6, %v1447_v38, %v3567_v15  ;;  %v4763_v9 = vld [vmem:[#allocation38_spill] sm:$0xff]  ;;  %v4764_v30 = vld [vmem:[#allocation12_spill] sm:$0xff] }
 0x1ef   : > { %1052 = vrot.lane.b32.xlu1 %v4748_v20, %s2508_s8  ;;  %2276 = vmatprep.mubr.msk.f32.mxu0 %vm1668_vm12, %v1628_v61  ;;  %v4757_v20 = vld [vmem:[#allocation50_spill] sm:$0xff]  ;;  %v1513_v37 = vsel %vm1491_vm7, %v1480_v47, %v3858_v45  ;;  %v1448_v25 = vsel %vm1425_vm5, %v1415_v16, %v4764_v30  ;;  %v4765_v61 = vld [vmem:[#allocation49_spill] sm:$0xff] }
 0x1f0   : > { %1022 = vrot.lane.b32.xlu0 %v4754_v14, %s2508_s8  ;;  %v1546_v27 = vsel %vm1524_vm8, %v1513_v37, %v3901_v5  ;;  %v4758_v45 = vld [vmem:[#allocation74_spill] sm:$0xff]  ;;  %v1399_v19 = vsel %vm214_vm0, %v2413_v31, %v4765_v61  ;;  %v1481_v52 = vsel %vm1458_vm6, %v1448_v25, %v3561_v40  ;;  %v4767_v37 = vld [vmem:[#allocation53_spill] sm:$0xff] }
 0x1f1   : > { %v3970_v23 = vpop.permute.xlu1 %941  ;;  %v1579_v51 = vsel %vm1557_vm9, %v1546_v27, %v1137_v4  ;;  %v890_v5 = vrot.slane %v4758_v45, 1  ;;  %v4760_v4 = vld [vmem:[#allocation16_spill] sm:$0xff]  ;;  %v991_v7 = vrot.slane %v4758_v45, 2  ;;  %v1432_v18 = vsel %vm1425_vm5, %v1399_v19, %v4766_v34 }
 0x1f2   : > { %v1308_v54 = vpop.permute.xlu0 %1307  ;;  %v1612_v15 = vsel %vm1590_vm11, %v1579_v51, %v1239_v41  ;;  %v1514_v28 = vsel %vm1491_vm7, %v1481_v52, %v3913_v49  ;;  %v4768_v51 = vld [vmem:[#allocation81_spill] sm:$0xff] }
 0x1f3   : > { %1351 = vrot.lane.b32.xlu1 %v4757_v20, %s2511_s4  ;;  %v1629_v0 = vsel %vm1623_vm10, %v1596_v62, %v1308_v54  ;;  %v993_v2 = vsel %vm614_vm3, %v991_v7, %v992_v58  ;;  %v1465_v62 = vsel %vm1458_vm6, %v1432_v18, %v3497_v35 }
 0x1f4   : > { %1118 = vrot.lane.b32.xlu0 %v2411_v6, %s2509_s9  ;;  %2277 = vmatmul.mubr.msk.f32.gmra.mxu0 %vm1668_vm12, %v1629_v0 }
 0x1f5   : > { %v1041_v22 = vpop.permute.xlu1 %1040 }
 0x1f6   : > { %v3989_v29 = vpop.permute.xlu0 %1010  ;;  %v1547_v54 = vsel %vm1524_vm8, %v1514_v28, %v1041_v22  ;;  %v2414_v22 = vld [vmem:[#allocation2 + $0x50] sm:$0xff] }
 0x1f7   : > { %1054 = vrot.lane.b32.xlu1 %v4757_v20, %s2508_s8  ;;  %v1498_v20 = vsel %vm1491_vm7, %v1465_v62, %v3625_v53  ;;  %v1400_v27 = vsel %vm214_vm0, %v2414_v22, %v4767_v37  ;;  %v4775_v28 = vld [vmem:[#allocation18_spill] sm:$0xff]  ;;  %v388_v62 = vld [vmem:[#allocation2 + $0x1a8] sm:$0x3] }
 0x1f8   : > { %1120 = vrot.lane.b32.xlu0 %v3752_v43, %s2509_s9  ;;  %v892_v43 = vsel %vm437_vm2, %v890_v5, %v891_v33  ;;  %v1531_v0 = vsel %vm1524_vm8, %v1498_v20, %v3959_v21  ;;  %v4770_v5 = vld [vmem:[#allocation104_spill] sm:$0xff]  ;;  %v994_v33 = vrot.slane %v4012_v8, 2  ;;  %v4773_v8 = vld [vmem:[#allocation15_spill] sm:$0xff]  ;;  %v1194_v20 = vrot.slane %v388_v62, 1  ;;  %v4777_v22 = vld [vmem:[#allocation65_spill] sm:$0xff] }
 0x1f9   : > { %v1340_v50 = vpop.permute.xlu1 %1339 }
 0x1fa   : > { %v1645_v10 = vsel %vm1623_vm10, %v1612_v15, %v1340_v50  ;;  %v1107_v44 = vpop.permute.xlu0 %1106  ;;  %v1433_v15 = vsel %vm1425_vm5, %v1400_v27, %v4768_v51  ;;  %v995_v16 = vsel %vm614_vm3, %v992_v58, %v994_v33  ;;  %v4778_v27 = vld [vmem:[#allocation40_spill] sm:$0xff] }
 0x1fb   : > { %1150 = vrot.lane.b32.xlu1 %v4758_v45, %s2509_s9  ;;  %2301 = vmatmul.mubr.msk.f32.gmra.mxu1 %vm1668_vm12, %v1645_v10  ;;  %v1564_v35 = vsel %vm1557_vm9, %v1531_v0, %v1107_v44  ;;  %v4769_v10 = vld [vmem:[#allocation89_spill] sm:$0xff]  ;;  %v4782_v33 = vld [vmem:[#allocation80_spill] sm:$0xff] }
 0x1fc   : > { %1220 = vrot.lane.b32.xlu0 %v4760_v4, %s2510_s21  ;;  %v1466_v44 = vsel %vm1458_vm6, %v1433_v15, %v4769_v10  ;;  %v2417_v15 = vld [vmem:[#allocation2 + $0x60] sm:$0xff] }
 0x1fd   : > { %v4005_v41 = vpop.permute.xlu1 %1042 }
 0x1fe   : > { %v1109_v55 = vpop.permute.xlu0 %1108 }
 0x1ff   : > { %1152 = vrot.lane.b32.xlu1 %v4759_v46, %s2509_s9  ;;  %v1499_v46 = vsel %vm1491_vm7, %v1466_v44, %v4770_v5  ;;  %v4781_v44 = vld [vmem:[#allocation22_spill] sm:$0xff] }
 0x200   : > { %923 = vrot.lane.b32.xlu0 %v4760_v4, %s2507_s7  ;;  %v1532_v4 = vsel %vm1524_vm8, %v1499_v46, %v3989_v29 }
 0x201   : > { %v1139_v3 = vpop.permute.xlu1 %1138 }
 0x202   : > { %v1209_v11 = vpop.permute.xlu0 %1208  ;;  %v1580_v38 = vsel %vm1557_vm9, %v1547_v54, %v1139_v3 }
 0x203   : > { %1252 = vrot.lane.b32.xlu1 %v892_v43, %s2510_s21  ;;  %v1597_v53 = vsel %vm1590_vm11, %v1564_v35, %v1209_v11  ;;  %v1565_v11 = vsel %vm1557_vm9, %v1532_v4, %v1109_v55 }
 0x204   : > { %1222 = vrot.lane.b32.xlu0 %v4761_v12, %s2510_s21 }
 0x205   : > { %v4018_v48 = vpop.permute.xlu1 %1140 }
 0x206   : > { %v4020_v24 = vpop.permute.xlu0 %943 }
 0x207   : > { %955 = vrot.lane.b32.xlu1 %v892_v43, %s2507_s7  ;;  %v4771_v43 = vld [vmem:[#allocation41_spill] sm:$0xff] }
 0x208   : > { %1321 = vrot.lane.b32.xlu0 %v4763_v9, %s2511_s4 }
 0x209   : > { %v1241_v14 = vpop.permute.xlu1 %1240 }
 0x20a   : > { %v1243_v36 = vpop.permute.xlu0 %1242  ;;  %v1613_v49 = vsel %vm1590_vm11, %v1580_v38, %v1241_v14 }
 0x20b   : > { %1254 = vrot.lane.b32.xlu1 %v894_v60, %s2510_s21 }
 0x20c   : > { %925 = vrot.lane.b32.xlu0 %v4761_v12, %s2507_s7  ;;  %v4772_v12 = vld [vmem:[#allocation66_spill] sm:$0xff] }
 0x20d   : > { %v1211_v40 = vpop.permute.xlu1 %1210  ;;  %v1416_v7 = vsel %vm214_vm0, %v2415_v17, %v4772_v12  ;;  %v1295_v17 = vrot.slane %v388_v62, 2  ;;  %v4783_v12 = vld [vmem:[#allocation23_spill] sm:$0xff] }
 0x20e   : > { %v1342_v47 = vpop.permute.xlu0 %1341  ;;  %v1449_v1 = vsel %vm1425_vm5, %v1416_v7, %v4773_v8 }
 0x20f   : > { %1353 = vrot.lane.b32.xlu1 %v993_v2, %s2511_s4  ;;  %v1646_v6 = vsel %vm1623_vm10, %v1613_v49, %v1342_v47 }
 0x210   : > { %1024 = vrot.lane.b32.xlu0 %v4763_v9, %s2508_s8  ;;  %2303 = vmatprep.mubr.msk.f32.mxu1 %vm1668_vm12, %v1646_v6  ;;  %v4774_v9 = vld [vmem:[#allocation25_spill] sm:$0xff]  ;;  %v2416_v6 = vld [vmem:[#allocation2 + $0x120] sm:$0xff] }
 0x211   : > { %v1310_v21 = vpop.permute.xlu1 %1309  ;;  %v1482_v14 = vsel %vm1458_vm6, %v1449_v1, %v4774_v9  ;;  %v1417_v37 = vsel %vm214_vm0, %v2416_v6, %v4777_v22  ;;  %v4785_v1 = vld [vmem:[#allocation24_spill] sm:$0xff] }
 0x212   : > { %v1630_v50 = vsel %vm1623_vm10, %v1597_v53, %v1310_v21  ;;  %v4067_v45 = vpop.permute.xlu0 %1012  ;;  %v1515_v30 = vsel %vm1491_vm7, %v1482_v14, %v3970_v23  ;;  %v386_v23 = vld [vmem:[#allocation2 + $0x198] sm:$0xff]  ;;  %v4779_v21 = vld [vmem:[#allocation13_spill] sm:$0xff]  ;;  %v4791_v22 = vld [vmem:[#allocation84_spill] sm:$0xff] }
 0x213   : > { %957 = vrot.lane.b32.xlu1 %v894_v60, %s2507_s7  ;;  %2279 = vmatprep.mubr.msk.f32.mxu0 %vm1668_vm12, %v1630_v50  ;;  %v1598_v60 = vsel %vm1590_vm11, %v1565_v11, %v1211_v40  ;;  %v1548_v25 = vsel %vm1524_vm8, %v1515_v30, %v4005_v41  ;;  %v1292_v49 = vrot.slane %v386_v23, 2  ;;  %v1450_v51 = vsel %vm1425_vm5, %v1417_v37, %v4779_v21  ;;  %v4780_v50 = vld [vmem:[#allocation52_spill] sm:$0xff] }
 0x214   : > { %1323 = vrot.lane.b32.xlu0 %v4771_v43, %s2511_s4  ;;  %v1581_v58 = vsel %vm1557_vm9, %v1548_v25, %v4018_v48  ;;  %v387_v48 = vld [vmem:[#allocation2 + $0x1a0] sm:$0xff]  ;;  %v1401_v10 = vsel %vm214_vm0, %v2417_v15, %v4780_v50  ;;  %v1483_v5 = vsel %vm1458_vm6, %v1450_v51, %v4781_v44 }
 0x215   : > { %v4078_v3 = vpop.permute.xlu1 %945  ;;  %v1614_v61 = vsel %vm1590_vm11, %v1581_v58, %v1243_v36  ;;  %v1191_v36 = vrot.slane %v386_v23, 1  ;;  %v1293_v47 = vrot.slane %v387_v48, 2  ;;  %v1434_v4 = vsel %vm1425_vm5, %v1401_v10, %v4782_v33  ;;  %v2418_v58 = vld [vmem:[#allocation2 + $0x68] sm:$0xff] }
 0x216   : > { %v1312_v39 = vpop.permute.xlu0 %1311  ;;  %v1467_v7 = vsel %vm1458_vm6, %v1434_v4, %v4783_v12 }
 0x217   : > { %1056 = vrot.lane.b32.xlu1 %v993_v2, %s2508_s8  ;;  %v1631_v29 = vsel %vm1623_vm10, %v1598_v60, %v1312_v39  ;;  %v1294_v11 = vsel %vm614_vm3, %v1292_v49, %v1293_v47  ;;  %v4784_v39 = vld [vmem:[#allocation42_spill] sm:$0xff]  ;;  %v1296_v25 = vsel %vm614_vm3, %v1293_v47, %v1295_v17  ;;  %v4790_v49 = vld [vmem:[#allocation68_spill] sm:$0xff] }
 0x218   : > { %1026 = vrot.lane.b32.xlu0 %v4771_v43, %s2508_s8  ;;  %2280 = vmatmul.mubr.msk.f32.gmra.mxu0 %vm1668_vm12, %v1631_v29  ;;  %v1516_v43 = vsel %vm1491_vm7, %v1483_v5, %v4020_v24  ;;  %v1500_v29 = vsel %vm1491_vm7, %v1467_v7, %v4785_v1  ;;  %v2420_v7 = vld [vmem:[#allocation2 + $0x138] sm:$0xff]  ;;  %v4795_v1 = vld [vmem:[#allocation54_spill] sm:$0xff] }
 0x219   : > { %v1045_v55 = vpop.permute.xlu1 %1044  ;;  %v1533_v24 = vsel %vm1524_vm8, %v1500_v29, %v4067_v45 }
 0x21a   : > { %v4098_v31 = vpop.permute.xlu0 %1014  ;;  %v1549_v60 = vsel %vm1524_vm8, %v1516_v43, %v1045_v55 }
 0x21b   : > { %1355 = vrot.lane.b32.xlu1 %v995_v16, %s2511_s4 }
 0x21c   : > { %1122 = vrot.lane.b32.xlu0 %v3803_v57, %s2509_s9  ;;  %v1192_v57 = vrot.slane %v387_v48, 1 }
 0x21d   : > { %v1344_v19 = vpop.permute.xlu1 %1343 }
 0x21e   : > { %v1647_v52 = vsel %vm1623_vm10, %v1614_v61, %v1344_v19  ;;  %v1111_v34 = vpop.permute.xlu0 %1110  ;;  %v1193_v40 = vsel %vm437_vm2, %v1191_v36, %v1192_v57  ;;  %v1195_v35 = vsel %vm437_vm2, %v1192_v57, %v1194_v20  ;;  %v4786_v61 = vld [vmem:[#allocation55_spill] sm:$0xff] }
 0x21f   : > { %1058 = vrot.lane.b32.xlu1 %v995_v16, %s2508_s8  ;;  %2304 = vmatmul.mubr.msk.f32.gmra.mxu1 %vm1668_vm12, %v1647_v52  ;;  %v1566_v30 = vsel %vm1557_vm9, %v1533_v24, %v1111_v34  ;;  %v1402_v19 = vsel %vm214_vm0, %v2418_v58, %v4786_v61  ;;  %v4788_v57 = vld [vmem:[#allocation91_spill] sm:$0xff] }
 0x220   : > { %1124 = vrot.lane.b32.xlu0 %v3861_v32, %s2509_s9  ;;  %v4776_v32 = vld [vmem:[#allocation21_spill] sm:$0xff] }
 0x221   : > { %v4111_v41 = vpop.permute.xlu1 %1046 }
 0x222   : > { %v1113_v18 = vpop.permute.xlu0 %1112 }
 0x223   : > { %1154 = vrot.lane.b32.xlu1 %v386_v23, %s2509_s9  ;;  %v4787_v23 = vld [vmem:[#allocation6_spill] sm:$0xff] }
 0x224   : > { %1224 = vrot.lane.b32.xlu0 %v4775_v28, %s2510_s21 }
 0x225   : > { %v1143_v2 = vpop.permute.xlu1 %1142 }
 0x226   : > { %v1213_v54 = vpop.permute.xlu0 %1212  ;;  %v1582_v16 = vsel %vm1557_vm9, %v1549_v60, %v1143_v2  ;;  %v4789_v2 = vld [vmem:[#allocation106_spill] sm:$0xff] }
 0x227   : > { %1156 = vrot.lane.b32.xlu1 %v387_v48, %s2509_s9  ;;  %v1599_v52 = vsel %vm1590_vm11, %v1566_v30, %v1213_v54  ;;  %v1435_v48 = vsel %vm1425_vm5, %v1402_v19, %v4787_v23  ;;  %s2179_s9 = sshll.u32 %s199_s6, 8 }
 0x228   : > { %1226 = vrot.lane.b32.xlu0 %v4776_v32, %s2510_s21  ;;  %v1468_v34 = vsel %vm1458_vm6, %v1435_v48, %v4788_v57  ;;  %v2419_v32 = vld [vmem:[#allocation2 + $0x128] sm:$0xff]  ;;  %s4261_s10 = scalar_lea.vmem [#allocation3], %s2179_s9 }
 0x229   : > { %v1145_v38 = vpop.permute.xlu1 %1144  ;;  %v1501_v62 = vsel %vm1491_vm7, %v1468_v34, %v4789_v2  ;;  %v1418_v47 = vsel %vm214_vm0, %v2419_v32, %v4790_v49  ;;  %v4800_v2 = vld [vmem:[#allocation57_spill] sm:$0xff]  ;;  %v4802_v49 = vld [vmem:[#allocation7_spill] sm:$0xff]  ;;  %s2073_s18 = sshll.u32 %s4261_s10, 4  ;;  %s4451_s18 = int_to_ptr.vmem [resolvable:$true] %s2073_s18 }
 0x22a   : > { %v4120_v0 = vpop.permute.xlu0 %947  ;;  %v1534_v54 = vsel %vm1524_vm8, %v1501_v62, %v4098_v31  ;;  %v1451_v37 = vsel %vm1425_vm5, %v1418_v47, %v4791_v22  ;;  %v4801_v62 = vld [vmem:[#allocation109_spill] sm:$0xff]  ;;  %s2425_s26 = scalar_lea.vmem %s4451_s18, 4096  ;;  %p2432_p1 = scmp.lt.s32.totalorder %s4451_s18, %s2430_s28 }
 0x22b   : > { %1256 = vrot.lane.b32.xlu1 %v1193_v40, %s2510_s21  ;;  %v1567_v20 = vsel %vm1557_vm9, %v1534_v54, %v1113_v18  ;;  %v1404_v54 = vsel %vm214_vm0, %v4801_v62, %v4800_v2  ;;  %v4810_v62 = vld [vmem:[#allocation92_spill] sm:$0xff]  ;;  %p2426_p12 = scmp.ne.s32.totalorder %s4451_s18, %s2425_s26  ;;  %p2433_p2 = scmp.lt.s32.totalorder %s2431_s29, %s2425_s26 }
 0x22c   : > { %1325 = vrot.lane.b32.xlu0 %v4778_v27, %s2511_s4  ;;  %v1437_v47 = vsel %vm1425_vm5, %v1404_v54, %v4802_v49 }
 0x22d   : > { %v1245_v53 = vpop.permute.xlu1 %1244  ;;  %p2427_p13 = pnand %p2426_p12, %p2574_p4  ;;  %p2434_p3 = por %p2433_p2, %p2432_p1 }
 0x22e   : > { %v1247_v46 = vpop.permute.xlu0 %1246  ;;  %v1615_v9 = vsel %vm1590_vm11, %v1582_v16, %v1245_v53  ;;  %v4792_v53 = vld [vmem:[#allocation98_spill] sm:$0xff]  ;;  %v4796_v16 = vld [vmem:[#allocation97_spill] sm:$0xff] }
 0x22f   : > { %1258 = vrot.lane.b32.xlu1 %v1195_v35, %s2510_s21  ;;  %v1484_v21 = vsel %vm1458_vm6, %v1451_v37, %v4792_v53  ;;  %v4804_v37 = vld [vmem:[#allocation33_spill] sm:$0xff]  ;;  %p2428_p0 = pneg %p2427_p13 }
 0x230   : > { %1327 = vrot.lane.b32.xlu0 %v4784_v39, %s2511_s4  ;;  %v1517_v18 = vsel %vm1491_vm7, %v1484_v21, %v4078_v3  ;;  %v4794_v39 = vld [vmem:[#allocation17_spill] sm:$0xff] }
 0x231   : > { %v1215_v8 = vpop.permute.xlu1 %1214  ;;  %v1550_v51 = vsel %vm1524_vm8, %v1517_v18, %v4111_v41  ;;  %v4793_v41 = vld [vmem:[#allocation67_spill] sm:$0xff]  ;;  %v2422_v18 = vld [vmem:[#allocation2 + $0x140] sm:$0xff]  ;;  %p2435_p5 = pnand %p2434_p3, %p2428_p0 }
 0x232   : > { %v1346_v14 = vpop.permute.xlu0 %1345  ;;  %v1600_v35 = vsel %vm1590_vm11, %v1567_v20, %v1215_v8  ;;  %v1583_v50 = vsel %vm1557_vm9, %v1550_v51, %v1145_v38  ;;  %v1419_v60 = vsel %vm214_vm0, %v2420_v7, %v4793_v41  ;;  %v2421_v8 = vld [vmem:[#allocation2 + $0x78] sm:$0xff]  ;;  %v4805_v51 = vld [vmem:[#allocation70_spill] sm:$0xff] }
 0x233   : > { %1357 = vrot.lane.b32.xlu1 %v1294_v11, %s2511_s4  ;;  %v1648_v55 = vsel %vm1623_vm10, %v1615_v9, %v1346_v14  ;;  %v1616_v10 = vsel %vm1590_vm11, %v1583_v50, %v1247_v46  ;;  %v1452_v46 = vsel %vm1425_vm5, %v1419_v60, %v4794_v39  ;;  %v1403_v29 = vsel %vm214_vm0, %v2421_v8, %v4795_v1  ;;  %v4797_v14 = vld [vmem:[#allocation82_spill] sm:$0xff] }
 0x234   : > { %2306 = vmatprep.mubr.msk.f32.mxu1 %vm1668_vm12, %v1648_v55  ;;  %v1485_v24 = vsel %vm1458_vm6, %v1452_v46, %v4796_v16  ;;  %v1436_v30 = vsel %vm1425_vm5, %v1403_v29, %v4797_v14  ;;  %v1420_v50 = vsel %vm214_vm0, %v2422_v18, %v4805_v51  ;;  %v4813_v18 = vld [vmem:[#allocation85_spill] sm:$0xff] }
 0x235   : > { %v1314_v45 = vpop.permute.xlu1 %1313  ;;  %v1518_v55 = vsel %vm1491_vm7, %v1485_v24, %v4120_v0 }
 0x236   : > { %v1632_v36 = vsel %vm1623_vm10, %v1599_v52, %v1314_v45  ;;  %v1017_v28 = vpop.permute.xlu0 %1016  ;;  %v4799_v52 = vld [vmem:[#allocation105_spill] sm:$0xff] }
 0x237   : > { %1359 = vrot.lane.b32.xlu1 %v1296_v25, %s2511_s4  ;;  %2282 = vmatprep.mubr.msk.f32.mxu0 %vm1668_vm12, %v1632_v36  ;;  %v4798_v25 = vld [vmem:[#allocation90_spill] sm:$0xff] }
 0x238   : > { %v1469_v58 = vsel %vm1458_vm6, %v1436_v30, %v4798_v25 }
 0x239   : > { %v4170_v40 = vpop.permute.xlu1 %949  ;;  %v1502_v45 = vsel %vm1491_vm7, %v1469_v58, %v4799_v52 }
 0x23a   : > { %v1316_v6 = vpop.permute.xlu0 %1315  ;;  %v1535_v48 = vsel %vm1524_vm8, %v1502_v45, %v1017_v28  ;;  %v4808_v45 = vld [vmem:[#allocation56_spill] sm:$0xff] }
 0x23b   : > { %v1633_v27 = vsel %vm1623_vm10, %v1600_v35, %v1316_v6  ;;  %v4803_v35 = vld [vmem:[#allocation93_spill] sm:$0xff] }
 0x23c   : > { %2283 = vmatmul.mubr.msk.f32.gmra.mxu0 %vm1668_vm12, %v1633_v27  ;;  %v1470_v6 = vsel %vm1458_vm6, %v1437_v47, %v4803_v35 }
 0x23d   : > { %v1049_v31 = vpop.permute.xlu1 %1048  ;;  %v1503_v27 = vsel %vm1491_vm7, %v1470_v6, %v4804_v37  ;;  %v2423_v6 = vld [vmem:[#allocation2 + $0x150] sm:$0xff]  ;;  %v4812_v37 = vld [vmem:[#allocation69_spill] sm:$0xff] }
 0x23e   : > { %v1019_v15 = vpop.permute.xlu0 %1018  ;;  %v1551_v61 = vsel %vm1524_vm8, %v1518_v55, %v1049_v31 }
 0x23f   : > { %v1536_v53 = vsel %vm1524_vm8, %v1503_v27, %v1019_v15  ;;  %v1421_v27 = vsel %vm214_vm0, %v2423_v6, %v4812_v37 }
 0x240   : > { %v1454_v51 = vsel %vm1425_vm5, %v1421_v27, %v4813_v18 }
 0x241   : > { %v1348_v44 = vpop.permute.xlu1 %1347 }
 0x242   : > { %v1649_v5 = vsel %vm1623_vm10, %v1616_v10, %v1348_v44  ;;  %v1115_v33 = vpop.permute.xlu0 %1114 }
 0x243   : > { %2307 = vmatmul.mubr.msk.f32.gmra.mxu1 %vm1668_vm12, %v1649_v5  ;;  %v1568_v34 = vsel %vm1557_vm9, %v1535_v48, %v1115_v33  ;;  %v4806_v5 = vld [vmem:[#allocation86_spill] sm:$0xff] }
 0x244   : > { %v1453_v33 = vsel %vm1425_vm5, %v1420_v50, %v4806_v5 }
 0x245   : > { %v1051_v4 = vpop.permute.xlu1 %1050 }
 0x246   : > { %v1117_v43 = vpop.permute.xlu0 %1116 }
 0x247   : > { %v1569_v31 = vsel %vm1557_vm9, %v1536_v53, %v1117_v43 }
 0x249   : > { %v1147_v11 = vpop.permute.xlu1 %1146 }
 0x24a   : > { %v1217_v17 = vpop.permute.xlu0 %1216  ;;  %v1584_v23 = vsel %vm1557_vm9, %v1551_v61, %v1147_v11 }
 0x24b   : > { %v1601_v20 = vsel %vm1590_vm11, %v1568_v34, %v1217_v17  ;;  %v4807_v17 = vld [vmem:[#allocation100_spill] sm:$0xff] }
 0x24c   : > { %v1486_v15 = vsel %vm1458_vm6, %v1453_v33, %v4807_v17 }
 0x24d   : > { %v1149_v12 = vpop.permute.xlu1 %1148  ;;  %v1519_v7 = vsel %vm1491_vm7, %v1486_v15, %v4170_v40  ;;  %v4255_v40 = vld [vmem:[%s4504_s2] ss:$0 sm:$0xff]  ;;  %v4815_v15 = vld [vmem:[#allocation59_spill] sm:$0xff] }
 0x24e   : > { %v4190_v3 = vpop.permute.xlu0 %951  ;;  %v1552_v41 = vsel %vm1524_vm8, %v1519_v7, %v1051_v4  ;;  %v1406_v7 = vsel %vm214_vm0, %v3779_v63, %v4815_v15 }
 0x251   : > { %v1249_v38 = vpop.permute.xlu1 %1248 }
 0x252   : > { %v1251_v9 = vpop.permute.xlu0 %1250  ;;  %v1617_v36 = vsel %vm1590_vm11, %v1584_v23, %v1249_v38  ;;  %v1585_v38 = vsel %vm1557_vm9, %v1552_v41, %v1149_v12  ;;  %v1405_v23 = vsel %vm214_vm0, %v3765_v13, %v4808_v45 }
 0x253   : > { %v1618_v39 = vsel %vm1590_vm11, %v1585_v38, %v1251_v9 }
 0x255   : > { %v1219_v19 = vpop.permute.xlu1 %1218 }
 0x256   : > { %v1350_v57 = vpop.permute.xlu0 %1349  ;;  %v1602_v10 = vsel %vm1590_vm11, %v1569_v31, %v1219_v19 }
 0x257   : > { %v1650_v0 = vsel %vm1623_vm10, %v1617_v36, %v1350_v57  ;;  %v4809_v57 = vld [vmem:[#allocation83_spill] sm:$0xff] }
 0x258   : > { %2309 = vmatprep.mubr.msk.f32.mxu1 %vm1668_vm12, %v1650_v0  ;;  %v1438_v34 = vsel %vm1425_vm5, %v1405_v23, %v4809_v57 }
 0x259   : > { %v1318_v32 = vpop.permute.xlu1 %1317  ;;  %v1471_v54 = vsel %vm1458_vm6, %v1438_v34, %v4810_v62 }
 0x25a   : > { %v1634_v28 = vsel %vm1623_vm10, %v1601_v20, %v1318_v32  ;;  %v1021_v22 = vpop.permute.xlu0 %1020  ;;  %v4811_v32 = vld [vmem:[#allocation107_spill] sm:$0xff] }
 0x25b   : > { %2285 = vmatprep.mubr.msk.f32.mxu0 %vm1668_vm12, %v1634_v28  ;;  %v1504_v49 = vsel %vm1491_vm7, %v1471_v54, %v4811_v32 }
 0x25c   : > { %v1537_v28 = vsel %vm1524_vm8, %v1504_v49, %v1021_v22 }
 0x25d   : > { %v4228_v21 = vpop.permute.xlu1 %953 }
 0x25e   : > { %v1320_v44 = vpop.permute.xlu0 %1319 }
 0x25f   : > { %v1635_v11 = vsel %vm1623_vm10, %v1602_v10, %v1320_v44  ;;  %v4814_v10 = vld [vmem:[#allocation99_spill] sm:$0xff] }
 0x260   : > { %2286 = vmatmul.mubr.msk.f32.gmra.mxu0 %vm1668_vm12, %v1635_v11  ;;  %v1487_v22 = vsel %vm1458_vm6, %v1454_v51, %v4814_v10  ;;  %v4823_v10 = vld [vmem:[#allocation8_spill] sm:$0xff] }
 0x261   : > { %v1053_v43 = vpop.permute.xlu1 %1052  ;;  %v1520_v5 = vsel %vm1491_vm7, %v1487_v22, %v4190_v3 }
 0x262   : > { %v4243_v60 = vpop.permute.xlu0 %1022  ;;  %v1553_v33 = vsel %vm1524_vm8, %v1520_v5, %v1053_v43 }
 0x265   : > { %v1352_v46 = vpop.permute.xlu1 %1351 }
 0x266   : > { %v1651_v8 = vsel %vm1623_vm10, %v1618_v39, %v1352_v46  ;;  %v1119_v1 = vpop.permute.xlu0 %1118  ;;  %v4816_v39 = vld [vmem:[#allocation9_spill] sm:$0xff] }
 0x267   : > { %2310 = vmatmul.mubr.msk.f32.gmra.mxu1 %vm1668_vm12, %v1651_v8  ;;  %v1570_v35 = vsel %vm1557_vm9, %v1537_v28, %v1119_v1  ;;  %v1439_v46 = vsel %vm1425_vm5, %v1406_v7, %v4816_v39  ;;  %v4817_v1 = vld [vmem:[#allocation95_spill] sm:$0xff] }
 0x268   : > { %v1472_v3 = vsel %vm1458_vm6, %v1439_v46, %v4817_v1 }
 0x269   : > { %v4249_v29 = vpop.permute.xlu1 %1054 }
 0x26a   : > { %v1121_v16 = vpop.permute.xlu0 %1120 }
 0x26c   : > { %v2272_v4 = vpop.f32.mrf.mxu0 }
 0x26d   : > { %v1151_v12 = vpop.permute.xlu1 %1150  ;;  %v1841_v24 = vadd.f32 %v2272_v4, %v4255_v40  ;;  %v4818_v4 = vld [vmem:[#allocation108_spill] sm:$0xff] }
 0x26e   : > { %v1221_v9 = vpop.permute.xlu0 %1220  ;;  %v1835_v14 = vpop.f32.mrf.mxu0  ;;  %v1586_v17 = vsel %vm1557_vm9, %v1553_v33, %v1151_v12  ;;  %v1505_v12 = vsel %vm1491_vm7, %v1472_v3, %v4818_v4  ;;  %v4824_v33 = vld [vmem:[#allocation94_spill] sm:$0xff]  ;;  %v4827_v4 = vld [vmem:[#allocation71_spill] sm:$0xff] }
 0x26f   : > { %v1995_v30 = vmax.f32 %v1841_v24, 0.0  ;;  %v1836_v55 = vadd.f32 %v4255_v40, %v1835_v14  ;;  %v1603_v53 = vsel %vm1590_vm11, %v1570_v35, %v1221_v9  ;;  %v1538_v63 = vsel %vm1524_vm8, %v1505_v12, %v4243_v60  ;;  %v2424_v14 = vld [vmem:[#allocation2 + $0x158] sm:$0xff] }
 0x270   : > { %v1571_v9 = vsel %vm1557_vm9, %v1538_v63, %v1121_v16  ;;  %v1423_v12 = vsel %vm214_vm0, %v3894_v56, %v4827_v4 }
 0x271   : > { %v1153_v25 = vpop.permute.xlu1 %1152  ;;  %2027 = vst [vmem:[%s4261_s10 + $0x8] sm:$0xff] %v1995_v30  ;;  %v1994_v58 = vmax.f32 %v1836_v55, 0.0  ;;  %v4819_v30 = vld [vmem:[#allocation72_spill] sm:$0xff] }
 0x272   : > { %v4264_v61 = vpop.permute.xlu0 %923  ;;  %v1422_v55 = vsel %vm214_vm0, %v2424_v14, %v4819_v30 }
 0x273   : > { %v2296_v19 = vpop.f32.mrf.mxu1  ;;  %2026 = vst [vmem:[%s4261_s10] sm:$0xff] %v1994_v58 }
 0x274   : > { %v1921_v52 = vadd.f32 %v2296_v19, %v4255_v40 }
 0x275   : > { %v1915_v48 = vpop.f32.mrf.mxu1  ;;  %v1253_v36 = vpop.permute.xlu1 %1252 }
 0x276   : > { %v2011_v0 = vmax.f32 %v1921_v52, 0.0  ;;  %v1916_v2 = vadd.f32 %v4255_v40, %v1915_v48  ;;  %v1223_v20 = vpop.permute.xlu0 %1222  ;;  %v1619_v41 = vsel %vm1590_vm11, %v1586_v17, %v1253_v36  ;;  %v4820_v52 = vld [vmem:[#allocation88_spill] sm:$0xff]  ;;  %v4821_v48 = vld [vmem:[#allocation102_spill] sm:$0xff] }
 0x277   : > { %v1604_v58 = vsel %vm1590_vm11, %v1571_v9, %v1223_v20  ;;  %v1455_v45 = vsel %vm1425_vm5, %v1422_v55, %v4820_v52 }
 0x278   : > { %2043 = vst [vmem:[%s4261_s10 + $0x88] sm:$0xff] %v2011_v0  ;;  %v2010_v47 = vmax.f32 %v1916_v2, 0.0  ;;  %v1488_v36 = vsel %vm1458_vm6, %v1455_v45, %v4821_v48  ;;  %v4831_v48 = vld [vmem:[#allocation73_spill] sm:$0xff] }
 0x279   : > { %v4280_v13 = vpop.permute.xlu1 %955  ;;  %v1521_v16 = vsel %vm1491_vm7, %v1488_v36, %v4228_v21  ;;  %v1424_v36 = vsel %vm214_vm0, %v3903_v26, %v4831_v48 }
 0x27a   : > { %2042 = vst [vmem:[%s4261_s10 + $0x80] sm:$0xff] %v2010_v47  ;;  %v1322_v31 = vpop.permute.xlu0 %1321  ;;  %v1554_v57 = vsel %vm1524_vm8, %v1521_v16, %v4249_v29 }
 0x27b   : > { %v1636_v50 = vsel %vm1623_vm10, %v1603_v53, %v1322_v31  ;;  %v1587_v0 = vsel %vm1557_vm9, %v1554_v57, %v1153_v25  ;;  %v4822_v31 = vld [vmem:[#allocation58_spill] sm:$0xff] }
 0x27c   : > { %2288 = vmatprep.mubr.msk.f32.mxu0 %vm1668_vm12, %v1636_v50  ;;  %v1407_v18 = vsel %vm214_vm0, %v3874_v59, %v4822_v31 }
 0x27d   : > { %v1255_v44 = vpop.permute.xlu1 %1254  ;;  %v1440_v22 = vsel %vm1425_vm5, %v1407_v18, %v4823_v10 }
 0x27e   : > { %v4296_v11 = vpop.permute.xlu0 %925  ;;  %v1620_v2 = vsel %vm1590_vm11, %v1587_v0, %v1255_v44  ;;  %v1473_v17 = vsel %vm1458_vm6, %v1440_v22, %v4824_v33  ;;  %v4832_v0 = vld [vmem:[#allocation20_spill] sm:$0xff] }
 0x27f   : > { %v1506_v7 = vsel %vm1491_vm7, %v1473_v17, %v4264_v61  ;;  %v4828_v61 = vld [vmem:[#allocation96_spill] sm:$0xff] }
 0x281   : > { %v1354_v38 = vpop.permute.xlu1 %1353 }
 0x282   : > { %v1652_v8 = vsel %vm1623_vm10, %v1619_v41, %v1354_v38  ;;  %v1025_v43 = vpop.permute.xlu0 %1024  ;;  %v4825_v38 = vld [vmem:[#allocation60_spill] sm:$0xff] }
 0x283   : > { %2312 = vmatprep.mubr.msk.f32.mxu1 %vm1668_vm12, %v1652_v8  ;;  %v1408_v59 = vsel %vm214_vm0, %v3889_v42, %v4825_v38  ;;  %v1539_v39 = vsel %vm1524_vm8, %v1506_v7, %v1025_v43  ;;  %v4826_v8 = vld [vmem:[#allocation10_spill] sm:$0xff]  ;;  %v4829_v42 = vld [vmem:[#allocation87_spill] sm:$0xff] }
 0x284   : > { %v1441_v1 = vsel %vm1425_vm5, %v1408_v59, %v4826_v8  ;;  %v1456_v43 = vsel %vm1425_vm5, %v1423_v12, %v4829_v42 }
 0x285   : > { %v4313_v24 = vpop.permute.xlu1 %957  ;;  %v1474_v63 = vsel %vm1458_vm6, %v1441_v1, %v4828_v61 }
 0x286   : > { %v1324_v19 = vpop.permute.xlu0 %1323  ;;  %v1507_v30 = vsel %vm1491_vm7, %v1474_v63, %v4296_v11 }
 0x287   : > { %v1637_v23 = vsel %vm1623_vm10, %v1604_v58, %v1324_v19  ;;  %v4830_v58 = vld [vmem:[#allocation101_spill] sm:$0xff] }
 0x288   : > { %2289 = vmatmul.mubr.msk.f32.gmra.mxu0 %vm1668_vm12, %v1637_v23  ;;  %v1489_v19 = vsel %vm1458_vm6, %v1456_v43, %v4830_v58 }
 0x289   : > { %v1057_v60 = vpop.permute.xlu1 %1056  ;;  %v1522_v45 = vsel %vm1491_vm7, %v1489_v19, %v4280_v13 }
 0x28a   : > { %v1027_v34 = vpop.permute.xlu0 %1026  ;;  %v1555_v11 = vsel %vm1524_vm8, %v1522_v45, %v1057_v60 }
 0x28b   : > { %v1540_v52 = vsel %vm1524_vm8, %v1507_v30, %v1027_v34  ;;  %v1457_v34 = vsel %vm1425_vm5, %v1424_v36, %v4832_v0 }
 0x28d   : > { %v1356_v62 = vpop.permute.xlu1 %1355 }
 0x28e   : > { %v1653_v54 = vsel %vm1623_vm10, %v1620_v2, %v1356_v62  ;;  %v1123_v20 = vpop.permute.xlu0 %1122 }
 0x28f   : > { %2313 = vmatmul.mubr.msk.f32.gmra.mxu1 %vm1668_vm12, %v1653_v54  ;;  %v1572_v3 = vsel %vm1557_vm9, %v1539_v39, %v1123_v20  ;;  %v4833_v54 = vld [vmem:[#allocation103_spill] sm:$0xff] }
 0x290   : > { %v2275_v32 = vpop.f32.mrf.mxu0  ;;  %v1490_v13 = vsel %vm1458_vm6, %v1457_v34, %v4833_v54 }
 0x291   : > { %v1059_v49 = vpop.permute.xlu1 %1058  ;;  %v1851_v21 = vadd.f32 %v2275_v32, %v4255_v40  ;;  %v1523_v60 = vsel %vm1491_vm7, %v1490_v13, %v4313_v24 }
 0x292   : > { %v1125_v47 = vpop.permute.xlu0 %1124  ;;  %v1845_v28 = vpop.f32.mrf.mxu0 }
 0x293   : > { %v1997_v29 = vmax.f32 %v1851_v21, 0.0  ;;  %v1846_v35 = vadd.f32 %v4255_v40, %v1845_v28  ;;  %v1573_v23 = vsel %vm1557_vm9, %v1540_v52, %v1125_v47  ;;  %v1556_v21 = vsel %vm1524_vm8, %v1523_v60, %v1059_v49 }
 0x295   : > { %v1155_v6 = vpop.permute.xlu1 %1154  ;;  %2029 = vst [vmem:[%s4261_s10 + $0x18] sm:$0xff] %v1997_v29  ;;  %v1996_v25 = vmax.f32 %v1846_v35, 0.0 }
 0x296   : > { %v1225_v37 = vpop.permute.xlu0 %1224  ;;  %v1588_v2 = vsel %vm1557_vm9, %v1555_v11, %v1155_v6 }
 0x297   : > { %v2299_v27 = vpop.f32.mrf.mxu1  ;;  %2028 = vst [vmem:[%s4261_s10 + $0x10] sm:$0xff] %v1996_v25  ;;  %v1605_v9 = vsel %vm1590_vm11, %v1572_v3, %v1225_v37 }
 0x298   : > { %v1931_v53 = vadd.f32 %v2299_v27, %v4255_v40 }
 0x299   : > { %v1925_v51 = vpop.f32.mrf.mxu1  ;;  %v1157_v50 = vpop.permute.xlu1 %1156 }
 0x29a   : > { %v2013_v44 = vmax.f32 %v1931_v53, 0.0  ;;  %v1926_v5 = vadd.f32 %v4255_v40, %v1925_v51  ;;  %v1227_v15 = vpop.permute.xlu0 %1226  ;;  %v1589_v47 = vsel %vm1557_vm9, %v1556_v21, %v1157_v50 }
 0x29b   : > { %v1606_v16 = vsel %vm1590_vm11, %v1573_v23, %v1227_v15 }
 0x29c   : > { %2045 = vst [vmem:[%s4261_s10 + $0x98] sm:$0xff] %v2013_v44  ;;  %v2012_v41 = vmax.f32 %v1926_v5, 0.0 }
 0x29d   : > { %v1257_v46 = vpop.permute.xlu1 %1256 }
 0x29e   : > { %2044 = vst [vmem:[%s4261_s10 + $0x90] sm:$0xff] %v2012_v41  ;;  %v1326_v14 = vpop.permute.xlu0 %1325  ;;  %v1621_v20 = vsel %vm1590_vm11, %v1588_v2, %v1257_v46 }
 0x29f   : > { %v1638_v55 = vsel %vm1623_vm10, %v1605_v9, %v1326_v14 }
 0x2a0   : > { %2291 = vmatprep.mubr.msk.f32.mxu0 %vm1668_vm12, %v1638_v55 }
 0x2a1   : > { %v1259_v56 = vpop.permute.xlu1 %1258 }
 0x2a2   : > { %v1328_v57 = vpop.permute.xlu0 %1327  ;;  %v1622_v28 = vsel %vm1590_vm11, %v1589_v47, %v1259_v56 }
 0x2a3   : > { %v1639_v62 = vsel %vm1623_vm10, %v1606_v16, %v1328_v57 }
 0x2a4   : > { %2292 = vmatmul.mubr.msk.f32.gmra.mxu0 %vm1668_vm12, %v1639_v62 }
 0x2a5   : > { %v1358_v26 = vpop.permute.xlu1 %1357 }
 0x2a6   : > { %v1654_v32 = vsel %vm1623_vm10, %v1621_v20, %v1358_v26 }
 0x2a7   : > { %2315 = vmatprep.mubr.msk.f32.mxu1 %vm1668_vm12, %v1654_v32 }
 0x2a9   : > { %v1360_v29 = vpop.permute.xlu1 %1359 }
 0x2aa   : > { %v1655_v35 = vsel %vm1623_vm10, %v1622_v28, %v1360_v29 }
 0x2ab   : > { %2316 = vmatmul.mubr.msk.f32.gmra.mxu1 %vm1668_vm12, %v1655_v35 }
 0x2b4   : > { %v2278_v6 = vpop.f32.mrf.mxu0 }
 0x2b5   : > { %v1861_v24 = vadd.f32 %v2278_v6, %v4255_v40 }
 0x2b6   : > { %v1855_v25 = vpop.f32.mrf.mxu0 }
 0x2b7   : > { %v1999_v37 = vmax.f32 %v1861_v24, 0.0  ;;  %v1856_v49 = vadd.f32 %v4255_v40, %v1855_v25 }
 0x2b9   : > { %2031 = vst [vmem:[%s4261_s10 + $0x28] sm:$0xff] %v1999_v37  ;;  %v1998_v27 = vmax.f32 %v1856_v49, 0.0 }
 0x2bb   : > { %v2302_v53 = vpop.f32.mrf.mxu1  ;;  %2030 = vst [vmem:[%s4261_s10 + $0x20] sm:$0xff] %v1998_v27 }
 0x2bc   : > { %v1941_v31 = vadd.f32 %v2302_v53, %v4255_v40 }
 0x2bd   : > { %v1935_v18 = vpop.f32.mrf.mxu1 }
 0x2be   : > { %v2015_v51 = vmax.f32 %v1941_v31, 0.0  ;;  %v1936_v50 = vadd.f32 %v4255_v40, %v1935_v18 }
 0x2c0   : > { %2047 = vst [vmem:[%s4261_s10 + $0xa8] sm:$0xff] %v2015_v51  ;;  %v2014_v10 = vmax.f32 %v1936_v50, 0.0 }
 0x2c2   : > { %2046 = vst [vmem:[%s4261_s10 + $0xa0] sm:$0xff] %v2014_v10 }
 0x2d8   : > { %v2281_v22 = vpop.f32.mrf.mxu0 }
 0x2d9   : > { %v1871_v44 = vadd.f32 %v2281_v22, %v4255_v40 }
 0x2da   : > { %v1865_v5 = vpop.f32.mrf.mxu0 }
 0x2db   : > { %v2001_v33 = vmax.f32 %v1871_v44, 0.0  ;;  %v1866_v17 = vadd.f32 %v4255_v40, %v1865_v5 }
 0x2dd   : > { %2033 = vst [vmem:[%s4261_s10 + $0x38] sm:$0xff] %v2001_v33  ;;  %v2000_v15 = vmax.f32 %v1866_v17, 0.0 }
 0x2df   : > { %v2305_v7 = vpop.f32.mrf.mxu1  ;;  %2032 = vst [vmem:[%s4261_s10 + $0x30] sm:$0xff] %v2000_v15 }
 0x2e0   : > { %v1951_v41 = vadd.f32 %v2305_v7, %v4255_v40 }
 0x2e1   : > { %v1945_v38 = vpop.f32.mrf.mxu1 }
 0x2e2   : > { %v2017_v59 = vmax.f32 %v1951_v41, 0.0  ;;  %v1946_v39 = vadd.f32 %v4255_v40, %v1945_v38 }
 0x2e4   : > { %2049 = vst [vmem:[%s4261_s10 + $0xb8] sm:$0xff] %v2017_v59  ;;  %v2016_v46 = vmax.f32 %v1946_v39, 0.0 }
 0x2e6   : > { %2048 = vst [vmem:[%s4261_s10 + $0xb0] sm:$0xff] %v2016_v46 }
 0x2fc   : > { %v2284_v8 = vpop.f32.mrf.mxu0 }
 0x2fd   : > { %v1881_v1 = vadd.f32 %v2284_v8, %v4255_v40 }
 0x2fe   : > { %v1875_v3 = vpop.f32.mrf.mxu0 }
 0x2ff   : > { %v2003_v4 = vmax.f32 %v1881_v1, 0.0  ;;  %v1876_v12 = vadd.f32 %v4255_v40, %v1875_v3 }
 0x301   : > { %2035 = vst [vmem:[%s4261_s10 + $0x48] sm:$0xff] %v2003_v4  ;;  %v2002_v61 = vmax.f32 %v1876_v12, 0.0 }
 0x303   : > { %v2308_v63 = vpop.f32.mrf.mxu1  ;;  %2034 = vst [vmem:[%s4261_s10 + $0x40] sm:$0xff] %v2002_v61 }
 0x304   : > { %v1961_v9 = vadd.f32 %v2308_v63, %v4255_v40 }
 0x305   : > { %v1955_v14 = vpop.f32.mrf.mxu1 }
 0x306   : > { %v2019_v42 = vmax.f32 %v1961_v9, 0.0  ;;  %v1956_v43 = vadd.f32 %v4255_v40, %v1955_v14 }
 0x308   : > { %2051 = vst [vmem:[%s4261_s10 + $0xc8] sm:$0xff] %v2019_v42  ;;  %v2018_v30 = vmax.f32 %v1956_v43, 0.0 }
 0x30a   : > { %2050 = vst [vmem:[%s4261_s10 + $0xc0] sm:$0xff] %v2018_v30 }
 0x320   : > { %v2287_v55 = vpop.f32.mrf.mxu0 }
 0x321   : > { %v1891_v58 = vadd.f32 %v2287_v55, %v4255_v40 }
 0x322   : > { %v1885_v19 = vpop.f32.mrf.mxu0 }
 0x323   : > { %v2005_v52 = vmax.f32 %v1891_v58, 0.0  ;;  %v1886_v56 = vadd.f32 %v4255_v40, %v1885_v19 }
 0x325   : > { %2037 = vst [vmem:[%s4261_s10 + $0x58] sm:$0xff] %v2005_v52  ;;  %v2004_v45 = vmax.f32 %v1886_v56, 0.0 }
 0x327   : > { %v2311_v23 = vpop.f32.mrf.mxu1  ;;  %2036 = vst [vmem:[%s4261_s10 + $0x50] sm:$0xff] %v2004_v45 }
 0x328   : > { %v1971_v48 = vadd.f32 %v2311_v23, %v4255_v40 }
 0x329   : > { %v1965_v36 = vpop.f32.mrf.mxu1 }
 0x32a   : > { %v2021_v11 = vmax.f32 %v1971_v48, 0.0  ;;  %v1966_v16 = vadd.f32 %v4255_v40, %v1965_v36 }
 0x32c   : > { %2053 = vst [vmem:[%s4261_s10 + $0xd8] sm:$0xff] %v2021_v11  ;;  %v2020_v57 = vmax.f32 %v1966_v16, 0.0 }
 0x32e   : > { %2052 = vst [vmem:[%s4261_s10 + $0xd0] sm:$0xff] %v2020_v57 }
 0x348   : > { %v2290_v0 = vpop.f32.mrf.mxu0 }
 0x349   : > { %v1901_v34 = vadd.f32 %v2290_v0, %v4255_v40 }
 0x34a   : > { %v1895_v2 = vpop.f32.mrf.mxu0 }
 0x34b   : > { %v2007_v62 = vmax.f32 %v1901_v34, 0.0  ;;  %v1896_v54 = vadd.f32 %v4255_v40, %v1895_v2 }
 0x34d   : > { %2039 = vst [vmem:[%s4261_s10 + $0x68] sm:$0xff] %v2007_v62  ;;  %v2006_v13 = vmax.f32 %v1896_v54, 0.0 }
 0x34f   : > { %v2314_v20 = vpop.f32.mrf.mxu1  ;;  %2038 = vst [vmem:[%s4261_s10 + $0x60] sm:$0xff] %v2006_v13 }
 0x350   : > { %v1981_v26 = vadd.f32 %v2314_v20, %v4255_v40 }
 0x351   : > { %v1975_v60 = vpop.f32.mrf.mxu1 }
 0x352   : > { %v2023_v32 = vmax.f32 %v1981_v26, 0.0  ;;  %v1976_v21 = vadd.f32 %v4255_v40, %v1975_v60 }
 0x354   : > { %2055 = vst [vmem:[%s4261_s10 + $0xe8] sm:$0xff] %v2023_v32  ;;  %v2022_v47 = vmax.f32 %v1976_v21, 0.0 }
 0x356   : > { %2054 = vst [vmem:[%s4261_s10 + $0xe0] sm:$0xff] %v2022_v47 }
 0x364   : > { %v2293_v28 = vpop.f32.mrf.mxu0 }
 0x365   : > { %v1911_v29 = vadd.f32 %v2293_v28, %v4255_v40 }
 0x366   : > { %v1905_v35 = vpop.f32.mrf.mxu0 }
 0x367   : > { %v2009_v6 = vmax.f32 %v1911_v29, 0.0  ;;  %v1906_v24 = vadd.f32 %v4255_v40, %v1905_v35 }
 0x369   : > { %2041 = vst [vmem:[%s4261_s10 + $0x78] sm:$0xff] %v2009_v6  ;;  %v2008_v25 = vmax.f32 %v1906_v24, 0.0 }
 0x36b   : > { %v2317_v37 = vpop.f32.mrf.mxu1  ;;  %2040 = vst [vmem:[%s4261_s10 + $0x70] sm:$0xff] %v2008_v25 }
 0x36c   : > { %v1991_v49 = vadd.f32 %v2317_v37, %v4255_v40 }
 0x36d   : > { %v1985_v27 = vpop.f32.mrf.mxu1 }
 0x36e   : > { %v2025_v53 = vmax.f32 %v1991_v49, 0.0  ;;  %v1986_v31 = vadd.f32 %v4255_v40, %v1985_v27 }
 0x370   : > { %2057 = vst [vmem:[%s4261_s10 + $0xf8] sm:$0xff] %v2025_v53  ;;  %v2024_v18 = vmax.f32 %v1986_v31, 0.0 }
 0x372   : > { %2056 = vst [vmem:[%s4261_s10 + $0xf0] sm:$0xff] %v2024_v18 }
 0x373   : > { %2438 = shalt.err (!%p2435_p5)
}
 0x374   : > { %s2439_s30 = scalar_lea.hbm %s4448_s23, 4096  ;;  %s2443_s7 = scalar_lea.hbm %s4505_s3, 8192 }
 0x375   : > { %p2440_p6 = scmp.ne.s32.totalorder %s4448_s23, %s2439_s30  ;;  %p2444_p10 = scmp.lt.s32.totalorder %s4448_s23, %s4505_s3 }
 0x376   : > { %p2445_p11 = scmp.lt.s32.totalorder %s2443_s7, %s2439_s30 }
 0x377   : > { %p2441_p7 = pnand %p2440_p6, %p2574_p4 }
 0x378   : > { %p2446_p12 = por %p2445_p11, %p2444_p10 }
 0x379   : > { %p2442_p9 = pneg %p2441_p7 }
 0x37b   : > { %p2447_p13 = pnand %p2446_p12, %p2442_p9 }
 0x37d   : > { %2450 = shalt.err (!%p2447_p13)
}
 0x37e   : > { %s2513_s10 = smov 128  }
 0x37f   : > { %2328 = dma.vmem_to_hbm [thread:$0]  (%p2574_p4), %s4451_s18, 4096, %s4448_s23, %s4456_s15, %s2513_s10, %s2513_s10, %s2505_s5  }
 0x380 PF: > { %p2334_p0 = scmp.ge.s32.totalorder %s2501_s17, 2  ;;  %s2088_s11 = sand.u32 1, %s2481_s12  }
 0x381   : > { %s2089_s19 = scalar_lea.sflag [#allocation4], %s2088_s11 }
 0x382   : > { %p2331_p1 = pnand %p2334_p0, %p2581_p8 }
 0x384   : > { %p2332_p2 = pneg %p2331_p1 }
 0x386   : > { %2476 = dma.done.wait (%p2332_p2), %s2089_s19, 4096  }
 0x387   : > { %2478 = vsyncadd (%p2332_p2), %s2089_s19, 4294963200  ;;  %s16_s17 = sadd.s32 1, %s2501_s17   ;;  %s4834_s12 = smov %s2485_s13 }
 0x388   : > { %p13_p3 = scmp.ge.s32.totalorder %s16_s17, 4   ;;  %s4835_s13 = smov %s2489_s14 }
 0x389   : > { %s4836_s14 = smov %s2587_s25  ;;  %s4837_s15 = smov %s2497_s16 }
 0x38a   : > { %s4838_s16 = smov %s4840_s20  ;;  %15 = sbr.rel (!%p13_p3) target bundleno = 4 (0x4), region = 74 }
 0x38f   :  { %2094 = vsyncpa [#allocation4], 1 }
 0x390   :  { %2096 = vsyncpa [#allocation4 + $0x1], 1 }

</bundles_post_ra>
